<compile_context>
chip_gen: v6e
topology: v6e:2x2x1
jax: 0.10.0
libtpu: 0.0.40
codegen_flags: <defaults>
</compile_context>

<pallas_src>
import functools
import math

import jax
import jax.numpy as jnp
from jax.experimental import pallas as pl
from jax.experimental.pallas import tpu as pltpu

BN_EPS = 1e-5
LANE = 128

_VMEM_CACHE = None


def _vmem_limits():
    """(scoped VMEM limit, strip working-set budget), derived from the chip's
    physical VMEM when available (v7x: 64 MiB/core, v5e/v6e: 128 MiB)."""
    global _VMEM_CACHE
    if _VMEM_CACHE is None:
        mib = 1024 * 1024
        cap = 0
        try:
            cap = int(getattr(pltpu.get_tpu_info(), "vmem_capacity_bytes", 0))
        except Exception:
            cap = 0
        if cap <= 0:
            cap = 64 * mib                       # conservative default (v7x)
        limit = max(32 * mib, min(cap - 16 * mib, 96 * mib))
        _VMEM_CACHE = (limit, int(limit * 0.75))
    return _VMEM_CACHE


# ---------------------------------------------------------------------------
# Fused SeparableConv2d kernel
# ---------------------------------------------------------------------------
def _sepconv_kernel(*refs, S, W, dil, stride, S_o, W_o,
                    activate_first, has_halo, res_mode):
    """One (batch, H-strip) step of:
       [relu0] -> depthwise 3x3 (dilation, BN1 scale folded into taps)
       -> [+bn1 bias, relu1] -> pointwise 1x1 (MXU, bf16, BN2 scale folded)
       -> +folded bias -> [relu2]  [+ residual (optionally 1x1 conv+BN skip)]"""
    d = dil
    if has_halo:
        xt_ref, xm_ref, xb_ref = refs[0], refs[1], refs[2]
        idx = 3
    else:
        xm_ref = refs[0]
        xt_ref = xb_ref = None
        idx = 1
    wdw_ref = refs[idx]
    idx += 1
    b1_ref = None
    if not activate_first:
        b1_ref = refs[idx]
        idx += 1
    wpw_ref, b2_ref = refs[idx], refs[idx + 1]
    idx += 2
    res_ref = wsk_ref = bsk_ref = None
    if res_mode is not None:
        res_ref = refs[idx]
        idx += 1
        if res_mode == "conv":
            wsk_ref, bsk_ref = refs[idx], refs[idx + 1]
            idx += 2
    o_ref = refs[idx]
    xpad_ref = refs[idx + 1]                     # VMEM scratch (S+2d, W+2d, Ci) f32

    f32 = jnp.float32
    Ci = xm_ref.shape[-1]
    Co = wpw_ref.shape[-1]
    i = pl.program_id(1)

    def prep(ref):
        v = ref[...].astype(f32)
        return jnp.maximum(v, 0.0) if activate_first else v       # relu0

    # ---- stage the zero-padded depthwise input ONCE (single store pass) ----
    zcol = jnp.zeros((S + 2 * d, d, Ci), f32)
    xpad_ref[:, 0:d, :] = zcol
    xpad_ref[:, W + d:W + 2 * d, :] = zcol
    xpad_ref[d:S + d, d:W + d, :] = prep(xm_ref)
    if has_halo:
        # Halo rows come from the neighbouring strips; at the image boundary the
        # (index-clamped) halo blocks hold in-image data, so gate them to zero.
        gate_t = (i > 0).astype(f32)
        gate_b = (i < pl.num_programs(1) - 1).astype(f32)
        xpad_ref[0:d, d:W + d, :] = prep(xt_ref) * gate_t
        xpad_ref[S + d:S + 2 * d, d:W + d, :] = prep(xb_ref) * gate_b
    else:
        zrow = jnp.zeros((d, W, Ci), f32)
        xpad_ref[0:d, d:W + d, :] = zrow
        xpad_ref[S + d:S + 2 * d, d:W + d, :] = zrow

    # ---- depthwise 3x3: 9 tap loads, accumulated in VALUES (no slab RMW).
    #      stride > 1 reads only the strided output rows/cols. ----
    wdw = wdw_ref[...].astype(f32)               # (9, Ci), bn1 scale pre-folded

    def tap(kh, kw):
        if stride == 1:
            return xpad_ref[kh * d:kh * d + S, kw * d:kw * d + W, :]
        return xpad_ref[pl.ds(kh * d, S_o, stride=stride),
                        pl.ds(kw * d, W_o, stride=stride), :]

    acc = tap(0, 0) * wdw[0]
    for k in range(1, 9):
        kh, kw = divmod(k, 3)
        acc = acc + tap(kh, kw) * wdw[k]

    if not activate_first:
        acc = jnp.maximum(acc + b1_ref[...].reshape(1, 1, Ci), 0.0)  # bn1 bias+relu1

    # ---- pointwise 1x1 on the MXU (bf16 weights, bn2 scale pre-folded) ----
    a2 = acc.reshape(S_o * W_o, Ci).astype(jnp.bfloat16)
    y = jnp.dot(a2, wpw_ref[...], preferred_element_type=jnp.float32)
    y = y + b2_ref[...]                          # folded bn2 (+ bn1) bias
    if not activate_first:
        y = jnp.maximum(y, 0.0)                  # relu2

    # ---- fused residual / skip branch ----
    if res_mode == "identity":
        y = y + res_ref[...].astype(f32).reshape(S_o * W_o, Co)
    elif res_mode == "conv":
        Cr = res_ref.shape[-1]
        if stride == 1:
            r = res_ref[...]
        else:
            r = res_ref[pl.ds(0, S_o, stride=stride),
                        pl.ds(0, W_o, stride=stride), :]
        r = r.astype(jnp.bfloat16).reshape(S_o * W_o, Cr)
        y = y + jnp.dot(r, wsk_ref[...], preferred_element_type=jnp.float32)
        y = y + bsk_ref[...]

    o_ref[...] = y.reshape(S_o, W_o, Co).astype(o_ref.dtype)


# ---------------------------------------------------------------------------
# Wrapper: strip selection, BlockSpecs, fused skip/residual plumbing
# ---------------------------------------------------------------------------
def _pick_strip(H, d, s, requested, row_bytes, budget):
    """Largest strip (input rows) that divides H, is a multiple of lcm(d, stride)
    and fits the per-step VMEM budget (or the explicit request)."""
    target = max(1, budget // max(row_bytes, 1))
    if requested is not None:
        target = min(target, requested)
    if target >= H:
        return H
    unit = (d * s) // math.gcd(d, s)
    best, cand = 0, unit
    while cand <= target:
        if H % cand == 0:
            best = cand
        cand += unit
    return best if best > 0 else H


def sepconv2d(x, params, *, dilation=1, stride=1, activate_first=True,
              residual=None, skip_params=None, strip_rows=None, out_dtype=None):
    """x: NHWC (channels already lane-padded).
       params = (w_dw(9,Ci) f32 [bn1 scale folded], b1(Ci,) f32 or None,
                 w_pw(Ci,Co) bf16 [bn2 scale folded], b2(Co,) f32 [folded bias]).
       residual: optional NHWC tensor at the *input* resolution, added in-kernel
                 (read strided in-kernel when stride > 1).
       skip_params: optional (w_sk(Cr,Co) bf16 [BN scale folded], b_sk(Co,) f32)."""
    w_dw, b1, w_pw, b2 = params
    assert (b1 is None) == activate_first
    N, H, W, Ci = x.shape
    Co = w_pw.shape[1]
    d, s = dilation, stride
    W_o = -(-W // s)
    out_dtype = x.dtype if out_dtype is None else out_dtype
    itm_in = x.dtype.itemsize
    itm_out = jnp.dtype(out_dtype).itemsize
    Cr = residual.shape[-1] if residual is not None else 0
    itm_res = residual.dtype.itemsize if residual is not None else 0

    vmem_limit, vmem_budget = _vmem_limits()

    # Honest VMEM accounting: double-buffered weights/biases + halo blocks are
    # strip-size independent; input/output/residual blocks, the padded f32
    # staging scratch and the kernel value temps scale with the strip.
    fixed = 2 * (w_dw.nbytes + w_pw.nbytes + b2.nbytes
                 + (b1.nbytes if b1 is not None else 0))
    if skip_params is not None:
        fixed += 2 * (skip_params[0].nbytes + skip_params[1].nbytes)
    fixed += 4 * d * W * Ci * itm_in                      # halo: 2 specs x 2 buffers
    per_row = 2 * W * Ci * itm_in                         # input strip (x2 buffers)
    per_row += (W + 2 * d) * Ci * 4                       # padded f32 staging scratch
    per_row += (W_o * Ci * (4 + 2)) // s                  # depthwise value + bf16 lhs
    per_row += (W_o * Co * 4) // s                        # f32 matmul result
    per_row += 2 * (W_o * Co * itm_out) // s              # output strip (x2 buffers)
    if residual is not None:
        per_row += 2 * W * Cr * itm_res                   # residual strip (x2 buffers)
    avail = max(vmem_budget - fixed, per_row)

    S = _pick_strip(H, d, s, strip_rows, per_row, avail)
    if S >= H and N < 2 and strip_rows is None:
        # v7x has 2 TensorCores: keep >= 2 "parallel" grid points for batch-1
        # inputs (but keep the MXU M-dim reasonably large).
        alt = _pick_strip(H, d, s, max(H // 2, 1), per_row, avail)
        if 0 < alt < H and (alt // s) * W_o >= 128:
            S = alt

    if S < H:
        # halo indexing below requires these (guaranteed by _pick_strip)
        assert S % d == 0 and S % s == 0 and H % S == 0, (S, d, s, H)
        has_halo, n_strips, S_o = True, H // S, S // s
    else:
        S, has_halo, n_strips, S_o = H, False, 1, -(-H // s)

    res_mode = None
    if residual is not None:
        res_mode = "conv" if skip_params is not None else "identity"

    kern = functools.partial(
        _sepconv_kernel, S=S, W=W, dil=d, stride=s, S_o=S_o, W_o=W_o,
        activate_first=activate_first, has_halo=has_halo, res_mode=res_mode)

    in_specs, args = [], []
    if has_halo:
        k = S // d                      # halo blocks are d rows each
        m = H // d
        in_specs += [
            pl.BlockSpec((None, d, W, Ci),
                         lambda n, i, k=k: (n, jnp.maximum(i * k - 1, 0), 0, 0)),
            pl.BlockSpec((None, S, W, Ci), lambda n, i: (n, i, 0, 0)),
            pl.BlockSpec((None, d, W, Ci),
                         lambda n, i, k=k, m=m: (n, jnp.minimum((i + 1) * k, m - 1), 0, 0)),
        ]
        args += [x, x, x]
    else:
        in_specs.append(pl.BlockSpec((None, S, W, Ci), lambda n, i: (n, 0, 0, 0)))
        args.append(x)

    in_specs.append(pl.BlockSpec((9, Ci), lambda n, i: (0, 0)))
    args.append(w_dw)
    if b1 is not None:
        in_specs.append(pl.BlockSpec((1, Ci), lambda n, i: (0, 0)))
        args.append(b1.reshape(1, Ci))
    in_specs += [pl.BlockSpec((Ci, Co), lambda n, i: (0, 0)),
                 pl.BlockSpec((1, Co), lambda n, i: (0, 0))]
    args += [w_pw, b2.reshape(1, Co)]

    if residual is not None:
        in_specs.append(pl.BlockSpec((None, S, W, Cr), lambda n, i: (n, i, 0, 0)))
        args.append(residual)
        if skip_params is not None:
            w_sk, b_sk = skip_params
            in_specs += [pl.BlockSpec((Cr, Co), lambda n, i: (0, 0)),
                         pl.BlockSpec((1, Co), lambda n, i: (0, 0))]
            args += [w_sk, b_sk.reshape(1, Co)]

    return pl.pallas_call(
        kern,
        grid=(N, n_strips),
        in_specs=in_specs,
        out_specs=pl.BlockSpec((None, S_o, W_o, Co), lambda n, i: (n, i, 0, 0)),
        out_shape=jax.ShapeDtypeStruct((N, n_strips * S_o, W_o, Co), out_dtype),
        scratch_shapes=[pltpu.VMEM((S + 2 * d, W + 2 * d, Ci), jnp.float32)],
        compiler_params=pltpu.CompilerParams(
            dimension_semantics=("parallel", "parallel"),
            vmem_limit_bytes=vmem_limit),
    )(*args)


# ---------------------------------------------------------------------------
# Block forward (NCHW in/out, PyTorch convention)
# ---------------------------------------------------------------------------
def _round_up(v, m):
    return ((v + m - 1) // m) * m


def _pad_to(a, axis, size):
    if a.shape[axis] == size:
        return a
    cfg = [(0, 0)] * a.ndim
    cfg[axis] = (0, size - a.shape[axis])
    return jnp.pad(a, cfg)


def _prepare_sepconv(p, activate_first):
    """Fold BN scales/biases into the weights, pad channels to the lane width and
    pre-cast the pointwise weights to bf16 (all host-side, one-time)."""
    w_dw, s1, b1, w_pw, s2, b2 = p
    ci, co = w_pw.shape
    w_dw_f = w_dw * s1[None, :]                  # bn1 scale into depthwise taps
    w_pw_f = w_pw * s2[None, :]                  # bn2 scale into pointwise columns
    if activate_first:
        b2_f = b2 + (b1 @ w_pw) * s2             # bn1 bias folded through pointwise
        b1_f = None
    else:
        b2_f = b2                                # relu1 sits between bn1 and pointwise
        b1_f = b1
    ci_p, co_p = _round_up(ci, LANE), _round_up(co, LANE)
    w_dw_f = _pad_to(w_dw_f, 1, ci_p)
    w_pw_f = _pad_to(_pad_to(w_pw_f, 0, ci_p), 1, co_p).astype(jnp.bfloat16)
    b2_f = _pad_to(b2_f, 0, co_p)
    if b1_f is not None:
        b1_f = _pad_to(b1_f, 0, ci_p)
    return (w_dw_f, b1_f, w_pw_f, b2_f)


def block_forward(x_nchw, params, *, strides=1, atrous=None, grow_first=True,
                  activate_first=True, strip_rows=None):
    """Pallas implementation of Block.forward. Input/output are NCHW."""
    del grow_first                       # encoded in the parameter shapes
    if atrous is None:
        atrous = [1] * 3
    elif isinstance(atrous, int):
        atrous = [atrous] * 3

    x = jnp.transpose(x_nchw, (0, 2, 3, 1))                  # NCHW -> NHWC
    cin = x.shape[-1]
    cin_p = _round_up(cin, LANE)
    xp = _pad_to(x, 3, cin_p)                                # lane-dense channels

    sc1 = _prepare_sepconv(params["sepconv1"], activate_first)
    sc2 = _prepare_sepconv(params["sepconv2"], activate_first)
    sc3 = _prepare_sepconv(params["sepconv3"], activate_first)
    out_filters = params["sepconv3"][3].shape[1]

    inter_dt = jnp.bfloat16                      # inter-sepconv HBM traffic in bf16
    h = sepconv2d(xp, sc1, dilation=atrous[0], stride=1,
                  activate_first=activate_first, strip_rows=strip_rows,
                  out_dtype=inter_dt)
    h = sepconv2d(h, sc2, dilation=atrous[1], stride=1,
                  activate_first=activate_first, strip_rows=strip_rows,
                  out_dtype=inter_dt)

    if params["skip"] is not None:
        w_sk, s_sk, b_sk = params["skip"]
        co_p = _round_up(w_sk.shape[1], LANE)
        w_sk_f = w_sk * s_sk[None, :]            # skip BN scale folded into weights
        skip_p = (_pad_to(_pad_to(w_sk_f, 0, cin_p), 1, co_p).astype(jnp.bfloat16),
                  _pad_to(b_sk, 0, co_p))
        # full-resolution residual; strided rows/cols are read in-kernel
        h = sepconv2d(h, sc3, dilation=atrous[2], stride=strides,
                      activate_first=activate_first,
                      residual=xp, skip_params=skip_p, strip_rows=strip_rows,
                      out_dtype=x.dtype)
    else:
        # identity skip (in == out channels, stride 1), fused residual add
        h = sepconv2d(h, sc3, dilation=atrous[2], stride=strides,
                      activate_first=activate_first,
                      residual=xp, skip_params=None, strip_rows=strip_rows,
                      out_dtype=x.dtype)

    h = h[..., :out_filters]                                 # drop lane padding
    return jnp.transpose(h, (0, 3, 1, 2))                    # NHWC -> NCHW


# ---------------------------------------------------------------------------
# Deterministic parameter init (shapes follow the PyTorch __init__)
# ---------------------------------------------------------------------------
def _fold_bn(key, c):
    k1, k2, k3, k4 = jax.random.split(key, 4)
    gamma = 1.0 + 0.1 * jax.random.normal(k1, (c,), jnp.float32)
    beta = 0.1 * jax.random.normal(k2, (c,), jnp.float32)
    mean = 0.1 * jax.random.normal(k3, (c,), jnp.float32)
    var = 1.0 + 0.1 * jax.random.uniform(k4, (c,), jnp.float32)
    scale = gamma / jnp.sqrt(var + BN_EPS)
    bias = beta - mean * scale
    return scale, bias


def _init_sepconv(key, cin, cout):
    k1, k2, k3, k4 = jax.random.split(key, 4)
    w_dw = 0.2 * jax.random.normal(k1, (9, cin), jnp.float32)     # depthwise 3x3
    s1, b1 = _fold_bn(k2, cin)
    w_pw = 0.2 * jax.random.normal(k3, (cin, cout), jnp.float32)  # pointwise
    s2, b2 = _fold_bn(k4, cout)
    return (w_dw, s1, b1, w_pw, s2, b2)


def init_block(key, in_filters, out_filters, strides=1, grow_first=True):
    ks = jax.random.split(key, 5)
    params = {}
    if out_filters != in_filters or strides != 1:
        w_sk = 0.2 * jax.random.normal(ks[0], (in_filters, out_filters), jnp.float32)
        s_sk, b_sk = _fold_bn(ks[1], out_filters)
        params["skip"] = (w_sk, s_sk, b_sk)
    else:
        params["skip"] = None
    filters = out_filters if grow_first else in_filters
    params["sepconv1"] = _init_sepconv(ks[2], in_filters, filters)
    params["sepconv2"] = _init_sepconv(ks[3], filters, out_filters)
    params["sepconv3"] = _init_sepconv(ks[4], out_filters, out_filters)
    return params


# ---------------------------------------------------------------------------
# Pure-JAX reference (correctness check)
# ---------------------------------------------------------------------------
def _sepconv_ref(x, params, dilation, stride, activate_first):
    w_dw, s1, b1, w_pw, s2, b2 = params
    if activate_first:
        x = jnp.maximum(x, 0.0)
    N, H, W, C = x.shape
    p = dilation
    xp = jnp.pad(x, ((0, 0), (p, p), (p, p), (0, 0)))
    acc = jnp.zeros((N, H, W, C), jnp.float32)
    for kh in range(3):
        for kw in range(3):
            acc = acc + xp[:, kh * dilation:kh * dilation + H,
                           kw * dilation:kw * dilation + W, :] * w_dw[kh * 3 + kw]
    acc = acc * s1 + b1
    if not activate_first:
        acc = jnp.maximum(acc, 0.0)
    y = jnp.einsum("nhwc,cd->nhwd", acc, w_pw)
    y = y * s2 + b2
    if not activate_first:
        y = jnp.maximum(y, 0.0)
    if stride != 1:
        y = y[:, ::stride, ::stride, :]
    return y


def block_ref(x_nchw, params, strides=1, atrous=None, activate_first=True):
    if atrous is None:
        atrous = [1] * 3
    elif isinstance(atrous, int):
        atrous = [atrous] * 3
    x = jnp.transpose(x_nchw, (0, 2, 3, 1))
    if params["skip"] is not None:
        w_sk, s_sk, b_sk = params["skip"]
        xs = x[:, ::strides, ::strides, :] if strides != 1 else x
        skip = jnp.einsum("nhwc,cd->nhwd", xs, w_sk) * s_sk + b_sk
    else:
        skip = x
    h = _sepconv_ref(x, params["sepconv1"], atrous[0], 1, activate_first)
    h = _sepconv_ref(h, params["sepconv2"], atrous[1], 1, activate_first)
    h = _sepconv_ref(h, params["sepconv3"], atrous[2], strides, activate_first)
    h = h + skip
    return jnp.transpose(h, (0, 3, 1, 2))


# ---------------------------------------------------------------------------
if __name__ == "__main__":
    key = jax.random.PRNGKey(0)
    k1, k2, k3, k4 = jax.random.split(key, 4)

    checks = []

    # Config A: conv skip branch, dilation 1, multi-strip (2 strips of 8 rows).
    N, Cin, H, W, Cout = 2, 8, 16, 16, 16
    xA = jax.random.normal(k1, (N, Cin, H, W), jnp.float32)
    pA = init_block(k2, Cin, Cout, strides=1, grow_first=True)
    refA = block_ref(xA, pA, strides=1, atrous=None, activate_first=True)
    outA = block_forward(xA, pA, strides=1, atrous=None, grow_first=True,
                         activate_first=True, strip_rows=8)
    checks.append(("A", outA, refA, (N, Cout, H, W)))

    # Config A2: same weights/input, single-strip path (no halo inputs).
    outA2 = block_forward(xA, pA, strides=1, atrous=None, grow_first=True,
                          activate_first=True, strip_rows=None)
    checks.append(("A2", outA2, refA, (N, Cout, H, W)))

    # Config B: identity skip, dilation 2, activate_first=False, grow_first=False.
    CinB = CoutB = 16
    xB = jax.random.normal(k3, (N, CinB, H, W), jnp.float32)
    pB = init_block(k4, CinB, CoutB, strides=1, grow_first=False)
    refB = block_ref(xB, pB, strides=1, atrous=2, activate_first=False)
    outB = block_forward(xB, pB, strides=1, atrous=2, grow_first=False,
                         activate_first=False, strip_rows=8)
    checks.append(("B", outB, refB, (N, CoutB, H, W)))

    # Tolerance note: the pointwise/skip matmuls, the folded weights and the two
    # inter-sepconv intermediates are bf16 (inference-grade precision).
    for name, out, ref, shape in checks:
        out = jax.block_until_ready(out)
        assert out.shape == shape, (name, out.shape)
        ok = bool(jnp.allclose(out, ref, atol=5e-2, rtol=5e-2))
        assert ok, (name, float(jnp.max(jnp.abs(out - ref))))

    print("KERNEL_OK")
</pallas_src>

<mosaic_0001>
module attributes {stable_mosaic.version = 11 : i64} {
  func.func @_sepconv_kernel(%arg0: i32, %arg1: i32, %arg2: memref<1x1x16x128xf32, #tpu.memory_space<vmem>>, %arg3: memref<1x8x16x128xf32, #tpu.memory_space<vmem>>, %arg4: memref<1x1x16x128xf32, #tpu.memory_space<vmem>>, %arg5: memref<9x128xf32, #tpu.memory_space<vmem>>, %arg6: memref<128x128xbf16, #tpu.memory_space<vmem>>, %arg7: memref<1x128xf32, #tpu.memory_space<vmem>>, %arg8: memref<1x8x16x128xbf16, #tpu.memory_space<vmem>>, %arg9: memref<10x18x128xf32, #tpu.memory_space<vmem>>) attributes {dimension_semantics = [#tpu.dimension_semantics<parallel>, #tpu.dimension_semantics<parallel>], iteration_bounds = array<i64: 2, 2>, scalar_prefetch = 0 : i64, scratch_operands = 1 : i64, tpu.core_type = #tpu.core_type<tc>, window_params = [{transform_indices = @transform_0, window_bounds = array<i64: 1, 1, 16, 128>}, {transform_indices = @transform_1, window_bounds = array<i64: 1, 8, 16, 128>}, {transform_indices = @transform_2, window_bounds = array<i64: 1, 1, 16, 128>}, {pipeline_mode = #tpu.pipeline_mode<synchronous>, transform_indices = @transform_3, window_bounds = array<i64: 9, 128>}, {pipeline_mode = #tpu.pipeline_mode<synchronous>, transform_indices = @transform_4, window_bounds = array<i64: 128, 128>}, {pipeline_mode = #tpu.pipeline_mode<synchronous>, transform_indices = @transform_5, window_bounds = array<i64: 1, 128>}, {transform_indices = @transform_6, window_bounds = array<i64: 1, 8, 16, 128>}]} {
    %cst = arith.constant 0.000000e+00 : f32
    %0 = vector.broadcast %cst : f32 to vector<10x1x128xf32>
    %c0 = arith.constant 0 : index
    %c0_0 = arith.constant 0 : index
    %c0_1 = arith.constant 0 : index
    %1 = vector.load %arg9[%c0, %c0_0, %c0_1] : memref<10x18x128xf32, #tpu.memory_space<vmem>>, vector<10x1x128xf32>
    tpu.vector_store %arg9[%c0, %c0_0, %c0_1], %0 {strides = array<i32>} : memref<10x18x128xf32, #tpu.memory_space<vmem>>, vector<10x1x128xf32>,
    %c0_2 = arith.constant 0 : index
    %c17 = arith.constant 17 : index
    %c0_3 = arith.constant 0 : index
    %2 = vector.load %arg9[%c0_2, %c17, %c0_3] : memref<10x18x128xf32, #tpu.memory_space<vmem>>, vector<10x1x128xf32>
    tpu.vector_store %arg9[%c0_2, %c17, %c0_3], %0 {strides = array<i32>} : memref<10x18x128xf32, #tpu.memory_space<vmem>>, vector<10x1x128xf32>,
    %c0_4 = arith.constant 0 : index
    %c0_5 = arith.constant 0 : index
    %c0_6 = arith.constant 0 : index
    %c0_7 = arith.constant 0 : index
    %3 = vector.load %arg3[%c0_4, %c0_5, %c0_6, %c0_7] : memref<1x8x16x128xf32, #tpu.memory_space<vmem>>, vector<1x8x16x128xf32>
    %4 = vector.shape_cast %3 : vector<1x8x16x128xf32> to vector<8x16x128xf32>
    %cst_8 = arith.constant 0.000000e+00 : f32
    %5 = vector.broadcast %cst_8 : f32 to vector<8x16x128xf32>
    %6 = arith.maximumf %4, %5 : vector<8x16x128xf32>
    %c1 = arith.constant 1 : index
    %c1_9 = arith.constant 1 : index
    %c0_10 = arith.constant 0 : index
    %7 = vector.load %arg9[%c1, %c1_9, %c0_10] : memref<10x18x128xf32, #tpu.memory_space<vmem>>, vector<8x16x128xf32>
    tpu.vector_store %arg9[%c1, %c1_9, %c0_10], %6 {strides = array<i32>} : memref<10x18x128xf32, #tpu.memory_space<vmem>>, vector<8x16x128xf32>,
    %c0_i32 = arith.constant 0 : i32
    %8 = arith.cmpi sgt, %arg1, %c0_i32 : i32
    %9 = arith.extui %8 : i1 to i32
    %10 = arith.sitofp %9 : i32 to f32
    %c1_i32 = arith.constant 1 : i32
    %11 = arith.cmpi slt, %arg1, %c1_i32 : i32
    %12 = arith.extui %11 : i1 to i32
    %13 = arith.sitofp %12 : i32 to f32
    %c0_11 = arith.constant 0 : index
    %c0_12 = arith.constant 0 : index
    %c0_13 = arith.constant 0 : index
    %c0_14 = arith.constant 0 : index
    %14 = vector.load %arg2[%c0_11, %c0_12, %c0_13, %c0_14] : memref<1x1x16x128xf32, #tpu.memory_space<vmem>>, vector<1x1x16x128xf32>
    %15 = vector.shape_cast %14 : vector<1x1x16x128xf32> to vector<1x16x128xf32>
    %cst_15 = arith.constant 0.000000e+00 : f32
    %16 = vector.broadcast %cst_15 : f32 to vector<1x16x128xf32>
    %17 = arith.maximumf %15, %16 : vector<1x16x128xf32>
    %18 = vector.broadcast %10 : f32 to vector<1x16x128xf32>
    %19 = arith.mulf %17, %18 : vector<1x16x128xf32>
    %c0_16 = arith.constant 0 : index
    %c1_17 = arith.constant 1 : index
    %c0_18 = arith.constant 0 : index
    %20 = vector.load %arg9[%c0_16, %c1_17, %c0_18] : memref<10x18x128xf32, #tpu.memory_space<vmem>>, vector<1x16x128xf32>
    tpu.vector_store %arg9[%c0_16, %c1_17, %c0_18], %19 {strides = array<i32>} : memref<10x18x128xf32, #tpu.memory_space<vmem>>, vector<1x16x128xf32>,
    %c0_19 = arith.constant 0 : index
    %c0_20 = arith.constant 0 : index
    %c0_21 = arith.constant 0 : index
    %c0_22 = arith.constant 0 : index
    %21 = vector.load %arg4[%c0_19, %c0_20, %c0_21, %c0_22] : memref<1x1x16x128xf32, #tpu.memory_space<vmem>>, vector<1x1x16x128xf32>
    %22 = vector.shape_cast %21 : vector<1x1x16x128xf32> to vector<1x16x128xf32>
    %cst_23 = arith.constant 0.000000e+00 : f32
    %23 = vector.broadcast %cst_23 : f32 to vector<1x16x128xf32>
    %24 = arith.maximumf %22, %23 : vector<1x16x128xf32>
    %25 = vector.broadcast %13 : f32 to vector<1x16x128xf32>
    %26 = arith.mulf %24, %25 : vector<1x16x128xf32>
    %c9 = arith.constant 9 : index
    %c1_24 = arith.constant 1 : index
    %c0_25 = arith.constant 0 : index
    %27 = vector.load %arg9[%c9, %c1_24, %c0_25] : memref<10x18x128xf32, #tpu.memory_space<vmem>>, vector<1x16x128xf32>
    tpu.vector_store %arg9[%c9, %c1_24, %c0_25], %26 {strides = array<i32>} : memref<10x18x128xf32, #tpu.memory_space<vmem>>, vector<1x16x128xf32>,
    %c0_26 = arith.constant 0 : index
    %c0_27 = arith.constant 0 : index
    %28 = vector.load %arg5[%c0_26, %c0_27] : memref<9x128xf32, #tpu.memory_space<vmem>>, vector<9x128xf32>
    %c0_28 = arith.constant 0 : index
    %c0_29 = arith.constant 0 : index
    %c0_30 = arith.constant 0 : index
    %29 = vector.load %arg9[%c0_28, %c0_29, %c0_30] : memref<10x18x128xf32, #tpu.memory_space<vmem>>, vector<8x16x128xf32>
    %30 = vector.extract_strided_slice %28 {offsets = [0, 0], sizes = [1, 128], strides = [1, 1]} : vector<9x128xf32> to vector<1x128xf32>
    %31 = vector.shape_cast %30 : vector<1x128xf32> to vector<128xf32>
    %32 = vector.shape_cast %31 : vector<128xf32> to vector<1x1x128xf32>
    %33 = vector.broadcast %32 : vector<1x1x128xf32> to vector<8x16x128xf32>
    %34 = arith.mulf %29, %33 : vector<8x16x128xf32>
    %c0_31 = arith.constant 0 : index
    %c1_32 = arith.constant 1 : index
    %c0_33 = arith.constant 0 : index
    %35 = vector.load %arg9[%c0_31, %c1_32, %c0_33] : memref<10x18x128xf32, #tpu.memory_space<vmem>>, vector<8x16x128xf32>
    %36 = vector.extract_strided_slice %28 {offsets = [1, 0], sizes = [1, 128], strides = [1, 1]} : vector<9x128xf32> to vector<1x128xf32>
    %37 = vector.shape_cast %36 : vector<1x128xf32> to vector<128xf32>
    %38 = vector.shape_cast %37 : vector<128xf32> to vector<1x1x128xf32>
    %39 = vector.broadcast %38 : vector<1x1x128xf32> to vector<8x16x128xf32>
    %40 = arith.mulf %35, %39 : vector<8x16x128xf32>
    %41 = arith.addf %34, %40 : vector<8x16x128xf32>
    %c0_34 = arith.constant 0 : index
    %c2 = arith.constant 2 : index
    %c0_35 = arith.constant 0 : index
    %42 = vector.load %arg9[%c0_34, %c2, %c0_35] : memref<10x18x128xf32, #tpu.memory_space<vmem>>, vector<8x16x128xf32>
    %43 = vector.extract_strided_slice %28 {offsets = [2, 0], sizes = [1, 128], strides = [1, 1]} : vector<9x128xf32> to vector<1x128xf32>
    %44 = vector.shape_cast %43 : vector<1x128xf32> to vector<128xf32>
    %45 = vector.shape_cast %44 : vector<128xf32> to vector<1x1x128xf32>
    %46 = vector.broadcast %45 : vector<1x1x128xf32> to vector<8x16x128xf32>
    %47 = arith.mulf %42, %46 : vector<8x16x128xf32>
    %48 = arith.addf %41, %47 : vector<8x16x128xf32>
    %c1_36 = arith.constant 1 : index
    %c0_37 = arith.constant 0 : index
    %c0_38 = arith.constant 0 : index
    %49 = vector.load %arg9[%c1_36, %c0_37, %c0_38] : memref<10x18x128xf32, #tpu.memory_space<vmem>>, vector<8x16x128xf32>
    %50 = vector.extract_strided_slice %28 {offsets = [3, 0], sizes = [1, 128], strides = [1, 1]} : vector<9x128xf32> to vector<1x128xf32>
    %51 = vector.shape_cast %50 : vector<1x128xf32> to vector<128xf32>
    %52 = vector.shape_cast %51 : vector<128xf32> to vector<1x1x128xf32>
    %53 = vector.broadcast %52 : vector<1x1x128xf32> to vector<8x16x128xf32>
    %54 = arith.mulf %49, %53 : vector<8x16x128xf32>
    %55 = arith.addf %48, %54 : vector<8x16x128xf32>
    %c1_39 = arith.constant 1 : index
    %c1_40 = arith.constant 1 : index
    %c0_41 = arith.constant 0 : index
    %56 = vector.load %arg9[%c1_39, %c1_40, %c0_41] : memref<10x18x128xf32, #tpu.memory_space<vmem>>, vector<8x16x128xf32>
    %57 = vector.extract_strided_slice %28 {offsets = [4, 0], sizes = [1, 128], strides = [1, 1]} : vector<9x128xf32> to vector<1x128xf32>
    %58 = vector.shape_cast %57 : vector<1x128xf32> to vector<128xf32>
    %59 = vector.shape_cast %58 : vector<128xf32> to vector<1x1x128xf32>
    %60 = vector.broadcast %59 : vector<1x1x128xf32> to vector<8x16x128xf32>
    %61 = arith.mulf %56, %60 : vector<8x16x128xf32>
    %62 = arith.addf %55, %61 : vector<8x16x128xf32>
    %c1_42 = arith.constant 1 : index
    %c2_43 = arith.constant 2 : index
    %c0_44 = arith.constant 0 : index
    %63 = vector.load %arg9[%c1_42, %c2_43, %c0_44] : memref<10x18x128xf32, #tpu.memory_space<vmem>>, vector<8x16x128xf32>
    %64 = vector.extract_strided_slice %28 {offsets = [5, 0], sizes = [1, 128], strides = [1, 1]} : vector<9x128xf32> to vector<1x128xf32>
    %65 = vector.shape_cast %64 : vector<1x128xf32> to vector<128xf32>
    %66 = vector.shape_cast %65 : vector<128xf32> to vector<1x1x128xf32>
    %67 = vector.broadcast %66 : vector<1x1x128xf32> to vector<8x16x128xf32>
    %68 = arith.mulf %63, %67 : vector<8x16x128xf32>
    %69 = arith.addf %62, %68 : vector<8x16x128xf32>
    %c2_45 = arith.constant 2 : index
    %c0_46 = arith.constant 0 : index
    %c0_47 = arith.constant 0 : index
    %70 = vector.load %arg9[%c2_45, %c0_46, %c0_47] : memref<10x18x128xf32, #tpu.memory_space<vmem>>, vector<8x16x128xf32>
    %71 = vector.extract_strided_slice %28 {offsets = [6, 0], sizes = [1, 128], strides = [1, 1]} : vector<9x128xf32> to vector<1x128xf32>
    %72 = vector.shape_cast %71 : vector<1x128xf32> to vector<128xf32>
    %73 = vector.shape_cast %72 : vector<128xf32> to vector<1x1x128xf32>
    %74 = vector.broadcast %73 : vector<1x1x128xf32> to vector<8x16x128xf32>
    %75 = arith.mulf %70, %74 : vector<8x16x128xf32>
    %76 = arith.addf %69, %75 : vector<8x16x128xf32>
    %c2_48 = arith.constant 2 : index
    %c1_49 = arith.constant 1 : index
    %c0_50 = arith.constant 0 : index
    %77 = vector.load %arg9[%c2_48, %c1_49, %c0_50] : memref<10x18x128xf32, #tpu.memory_space<vmem>>, vector<8x16x128xf32>
    %78 = vector.extract_strided_slice %28 {offsets = [7, 0], sizes = [1, 128], strides = [1, 1]} : vector<9x128xf32> to vector<1x128xf32>
    %79 = vector.shape_cast %78 : vector<1x128xf32> to vector<128xf32>
    %80 = vector.shape_cast %79 : vector<128xf32> to vector<1x1x128xf32>
    %81 = vector.broadcast %80 : vector<1x1x128xf32> to vector<8x16x128xf32>
    %82 = arith.mulf %77, %81 : vector<8x16x128xf32>
    %83 = arith.addf %76, %82 : vector<8x16x128xf32>
    %c2_51 = arith.constant 2 : index
    %c2_52 = arith.constant 2 : index
    %c0_53 = arith.constant 0 : index
    %84 = vector.load %arg9[%c2_51, %c2_52, %c0_53] : memref<10x18x128xf32, #tpu.memory_space<vmem>>, vector<8x16x128xf32>
    %85 = vector.extract_strided_slice %28 {offsets = [8, 0], sizes = [1, 128], strides = [1, 1]} : vector<9x128xf32> to vector<1x128xf32>
    %86 = vector.shape_cast %85 : vector<1x128xf32> to vector<128xf32>
    %87 = vector.shape_cast %86 : vector<128xf32> to vector<1x1x128xf32>
    %88 = vector.broadcast %87 : vector<1x1x128xf32> to vector<8x16x128xf32>
    %89 = arith.mulf %84, %88 : vector<8x16x128xf32>
    %90 = arith.addf %83, %89 : vector<8x16x128xf32>
    %91 = vector.shape_cast %90 : vector<8x16x128xf32> to vector<128x128xf32>
    %92 = arith.truncf %91 : vector<128x128xf32> to vector<128x128xbf16>
    %c0_54 = arith.constant 0 : index
    %c0_55 = arith.constant 0 : index
    %93 = vector.load %arg6[%c0_54, %c0_55] : memref<128x128xbf16, #tpu.memory_space<vmem>>, vector<128x128xbf16>
    %cst_56 = arith.constant dense<0.000000e+00> : vector<128x128xf32>
    %94 = tpu.matmul %92, %93, %cst_56 {dimension_numbers = #tpu.dot_dimension_numbers<[1], [0], [0], [1], [0, 0, 1, 1], [], []>} : vector<128x128xbf16>, vector<128x128xbf16>, vector<128x128xf32> -> vector<128x128xf32>
    %c0_57 = arith.constant 0 : index
    %c0_58 = arith.constant 0 : index
    %95 = vector.load %arg7[%c0_57, %c0_58] : memref<1x128xf32, #tpu.memory_space<vmem>>, vector<1x128xf32>
    %96 = vector.broadcast %95 : vector<1x128xf32> to vector<128x128xf32>
    %97 = arith.addf %94, %96 : vector<128x128xf32>
    %98 = vector.shape_cast %97 : vector<128x128xf32> to vector<8x16x128xf32>
    %99 = arith.truncf %98 : vector<8x16x128xf32> to vector<8x16x128xbf16>
    %c0_59 = arith.constant 0 : index
    %c0_60 = arith.constant 0 : index
    %c0_61 = arith.constant 0 : index
    %c0_62 = arith.constant 0 : index
    %100 = vector.load %arg8[%c0_59, %c0_60, %c0_61, %c0_62] : memref<1x8x16x128xbf16, #tpu.memory_space<vmem>>, vector<1x8x16x128xbf16>
    %101 = vector.shape_cast %100 : vector<1x8x16x128xbf16> to vector<8x16x128xbf16>
    %102 = vector.shape_cast %99 : vector<8x16x128xbf16> to vector<1x8x16x128xbf16>
    tpu.vector_store %arg8[%c0_59, %c0_60, %c0_61, %c0_62], %102 {strides = array<i32>} : memref<1x8x16x128xbf16, #tpu.memory_space<vmem>>, vector<1x8x16x128xbf16>,
    return
  }
  func.func @transform_0(%arg0: i32, %arg1: i32) -> (i32, i32, i32, i32) {
    %c8_i32 = arith.constant 8 : i32
    %0 = arith.muli %arg1, %c8_i32 : i32
    %c1_i32 = arith.constant 1 : i32
    %1 = arith.subi %0, %c1_i32 : i32
    %c0_i32 = arith.constant 0 : i32
    %2 = arith.maxsi %1, %c0_i32 : i32
    %c0_i32_0 = arith.constant 0 : i32
    %c0_i32_1 = arith.constant 0 : i32
    %c0_i32_2 = arith.constant 0 : i32
    return %arg0, %2, %c0_i32_0, %c0_i32_1 : i32, i32, i32, i32
  }
  func.func @transform_1(%arg0: i32, %arg1: i32) -> (i32, i32, i32, i32) {
    %c0_i32 = arith.constant 0 : i32
    %c0_i32_0 = arith.constant 0 : i32
    %c0_i32_1 = arith.constant 0 : i32
    return %arg0, %arg1, %c0_i32, %c0_i32_0 : i32, i32, i32, i32
  }
  func.func @transform_2(%arg0: i32, %arg1: i32) -> (i32, i32, i32, i32) {
    %c1_i32 = arith.constant 1 : i32
    %0 = arith.addi %arg1, %c1_i32 : i32
    %c8_i32 = arith.constant 8 : i32
    %1 = arith.muli %0, %c8_i32 : i32
    %c15_i32 = arith.constant 15 : i32
    %2 = arith.minsi %1, %c15_i32 : i32
    %c0_i32 = arith.constant 0 : i32
    %c0_i32_0 = arith.constant 0 : i32
    %c0_i32_1 = arith.constant 0 : i32
    return %arg0, %2, %c0_i32, %c0_i32_0 : i32, i32, i32, i32
  }
  func.func @transform_3(%arg0: i32, %arg1: i32) -> (i32, i32) {
    %c0_i32 = arith.constant 0 : i32
    %c0_i32_0 = arith.constant 0 : i32
    %c0_i32_1 = arith.constant 0 : i32
    return %c0_i32, %c0_i32_0 : i32, i32
  }
  func.func @transform_4(%arg0: i32, %arg1: i32) -> (i32, i32) {
    %c0_i32 = arith.constant 0 : i32
    %c0_i32_0 = arith.constant 0 : i32
    %c0_i32_1 = arith.constant 0 : i32
    return %c0_i32, %c0_i32_0 : i32, i32
  }
  func.func @transform_5(%arg0: i32, %arg1: i32) -> (i32, i32) {
    %c0_i32 = arith.constant 0 : i32
    %c0_i32_0 = arith.constant 0 : i32
    %c0_i32_1 = arith.constant 0 : i32
    return %c0_i32, %c0_i32_0 : i32, i32
  }
  func.func @transform_6(%arg0: i32, %arg1: i32) -> (i32, i32, i32, i32) {
    %c0_i32 = arith.constant 0 : i32
    %c0_i32_0 = arith.constant 0 : i32
    %c0_i32_1 = arith.constant 0 : i32
    return %arg0, %arg1, %c0_i32, %c0_i32_0 : i32, i32, i32, i32
  }
}

</mosaic_0001>

<bundles_post_ra>
// kernel: tpu_custom_call.1
= control target key start
LH: loop header
LB: loop body
LE: loop exit
PB: predicated region body
PF: predicated region fallthrough
CT: control target
= control target key end

     0   :  { %s3062_s0 = inlined_call_operand.hbm [shape: f32[2,16,16,128], index: 0, kind: input, shape index: {}]   ;;  %s3063_s1 = inlined_call_operand.hbm [shape: f32[2,16,16,128], index: 1, kind: input, shape index: {}]   ;;  %s3064_s2 = inlined_call_operand.hbm [shape: f32[2,16,16,128], index: 2, kind: input, shape index: {}]   ;;  %s3065_s3 = inlined_call_operand.hbm [shape: f32[9,128], index: 3, kind: input, shape index: {}]   ;;  %s3066_s4 = inlined_call_operand.hbm [shape: bf16[128,128], index: 4, kind: input, shape index: {}]   ;;  %s3067_s5 = inlined_call_operand.vmem [shape: f32[1,128], index: 5, kind: input, shape index: {}]   ;;  %s3068_s6 = inlined_call_operand.hbm [shape: bf16[2,16,16,128], index: 6, kind: output, shape index: {}]  }
   0x1   :  { %3127 = sst [smem:[#allocation50_spill]] %s3063_s1 }
   0x2   :  { %3128 = sst [smem:[#allocation51_spill]] %s3064_s2 }
   0x3   :  { %3129 = sst [smem:[#allocation52_spill]] %s3065_s3 }
   0x4   :  { %3130 = sst [smem:[#allocation53_spill]] %s3066_s4 }
   0x5   :  { %3131 = sst [smem:[#allocation54_spill]] %s3067_s5 }
   0x6   :  { %3132 = sst [smem:[#allocation55_spill]] %s3068_s6 }
   0x7   :  { %11 = vsyncpa [#allocation4], 0 }
   0x8   :  { %13 = vsyncpa [#allocation4 + $0x1], 0 }
   0x9   :  { %14 = vsyncpa [#allocation7], 0 }
   0xa   :  { %16 = vsyncpa [#allocation7 + $0x1], 0 }
   0xb   :  { %17 = vsyncpa [#allocation10], 0 }
   0xc   :  { %18 = vsyncpa [#allocation5], 0 }
   0xd   :  { %20 = vsyncpa [#allocation5 + $0x1], 0  ;;  %s2135_s21 = smov 0   ;;  %s2137_s22 = smov 0  }
   0xe   :  { %s2139_s23 = smov 0   ;;  %s2141_s24 = smov 0  }
   0xf   :  { %s2143_s25 = smov 0   ;;  %s2145_s26 = smov 0  }
  0x10   :  { %s2147_s27 = smov 0   ;;  %s2149_s28 = smov 0  }
  0x11   :  { %s2151_s29 = smov 0   ;;  %s2153_s30 = smov 0  }
  0x12   :  { %s2155_s7 = smov 0   ;;  %s2157_s8 = smov 0  }
  0x13   :  { %s2159_s9 = smov 0   ;;  %s2161_s10 = smov 0  }
  0x14 LB: > { %3133 = sst [smem:[#allocation18_spill]] %s2033_s21  ;;  %s2206_s11 = sadd.s32 4294967295, %s2085_s10   ;;  %s2085_s10 = sphi %s2161_s10, %s26_s10   ;;  %s2081_s9 = sphi %s2159_s9, %s3238_s9   ;;  %s2077_s8 = sphi %s2157_s8, %s3237_s8   ;;  %s2073_s7 = sphi %s2155_s7, %s3236_s7   ;;  %s2069_s30 = sphi %s2153_s30, %s3235_s30   ;;  %s2065_s29 = sphi %s2151_s29, %s3245_s29   ;;  %s2061_s28 = sphi %s2149_s28, %s3244_s28   ;;  %s2057_s27 = sphi %s2147_s27, %s3243_s27   ;;  %s2053_s26 = sphi %s2145_s26, %s3242_s26   ;;  %s2049_s25 = sphi %s2143_s25, %s3241_s25   ;;  %s2045_s24 = sphi %s2141_s24, %s3233_s24   ;;  %s2041_s23 = sphi %s2139_s23, %s3240_s23   ;;  %s2037_s22 = sphi %s2137_s22, %s3239_s22   ;;  %s2033_s21 = sphi %s2135_s21, %s3232_s21  }
  0x15   : > { %3134 = sst [smem:[#allocation19_spill]] %s2037_s22  ;;  %p1426_p0 = scmp.ge.s32.totalorder %s2085_s10, 1 }
  0x16   : > { %3135 = sst [smem:[#allocation20_spill]] %s2045_s24  ;;  %p3084_p1 = scmp.eq.s32.totalorder %s2206_s11, 0 }
  0x17   : > { %3136 = sst [smem:[#allocation21_spill]] %s2049_s25  ;;  %p221_p2 = scmp.eq.s32.totalorder %s2206_s11, 3 }
  0x18   : > { %3137 = sst [smem:[#allocation22_spill]] %s2069_s30  ;;  %p234_p3 = scmp.lt.s32.totalorder %s2085_s10, 5 }
  0x19   : > { %3138 = sst [smem:[#allocation23_spill]] %s2073_s7  ;;  %s2087_s13 = smov [#allocation9]  }
  0x1a   : > { %3139 = sst [smem:[#allocation24_spill]] %s2077_s8  ;;  %p2212_p4 = pnand %p1426_p0, %p234_p3 }
  0x1b   : > { %3140 = sst [smem:[#allocation25_spill]] %s2081_s9  ;;  %s246_s14 = sshll.u32 %s2087_s13, 4  ;;  %s247_s14 = int_to_ptr.vmem [resolvable:$true] %s246_s14 }
  0x1c   : > { %s3141_s12 = scalar_select %p2212_p4, 1, 0 }
  0x1d   : > { %p1637_p5 = pneg %p2212_p4  ;;  %s1804_s16 = scalar_lea.vmem %s247_s14, 256 }
  0x1e   : > { %3142 = sst [smem:[#allocation26_spill]] %s3141_s12  ;;  %p1805_p8 = scmp.ne.s32.totalorder %s247_s14, %s1804_s16 }
  0x1f   : > { %p2220_p6 = pnand %p1637_p5, %p3084_p1  ;;  %p1812_p11 = scmp.lt.s32.totalorder %s247_s14, %s247_s14 }
  0x20   : > { %p1813_p12 = scmp.lt.s32.totalorder %s1804_s16, %s1804_s16 }
  0x21   : > { %p3087_p7 = pneg %p2220_p6 }
  0x22   : > { %p1814_p13 = por %p1813_p12, %p1812_p11 }
  0x23   : > { %p1807_p9 = pnand %p1805_p8, %p3087_p7 }
  0x25   : > { %p1808_p10 = pneg %p1807_p9 }
  0x27   : > { %p1815_p0 = pnand %p1814_p13, %p1808_p10 }
  0x29   : > { %1818 = shalt.err (!%p1815_p0)
}
  0x2a   : > { %s3070_s17 = smov 128   ;;  %s3072_s18 = smov 8  }
  0x2b   : > { %s3144_s3 = sld [smem:[#allocation52_spill]]  ;;  %s1419_s13 = sadd.s32 4294967294, %s2085_s10  }
  0x2c   : > { %s35_s16 = sadd.s32 1, %s2077_s8  ;;  %s38_s6 = sadd.s32 1, %s2081_s9 }
  0x2d   : > { %p36_p3 = scmp.ge.s32.totalorder %s35_s16, 2  ;;  %p3085_p5 = scmp.eq.s32.totalorder %s2085_s10, 0 }
  0x2e   : > { %p90_p8 = scmp.ne.s32.totalorder %s2053_s26, %s2049_s25  ;;  %p96_p9 = scmp.ne.s32.totalorder %s2049_s25, %s2045_s24 }
  0x2f   : > { %s3247_s16 = smov (%p36_p3, %s35_s16), 0  ;;  %s3249_s6 = smov (!%p36_p3, %s38_s6), %s2081_s9 }
  0x30   : > { %3145 = sst [smem:[#allocation27_spill]] %s3247_s16  ;;  %p227_p10 = scmp.eq.s32.totalorder %s1419_s13, 3 }
  0x31   : > { %1640 = dma.hbm_to_vmem [thread:$0]  (!%p2220_p6), %s3144_s3, 256, %s247_s14, [#allocation10], %s3070_s17, %s3070_s17, %s3072_s18  }
  0x32   : > { %p2255_p11 = por %p90_p8, %p3085_p5  ;;  %p2261_p12 = por %p221_p2, %p90_p8 }
  0x33   : > { %p2267_p13 = por %p96_p9, %p3084_p1  ;;  %p2271_p0 = por %p227_p10, %p96_p9 }
  0x34   : > { %s3147_s19 = scalar_select %p2261_p12, 1, 0 }
  0x35   : > { %s3149_s20 = scalar_select %p2267_p13, 1, 0 }
  0x36   : > { %3148 = sst [smem:[#allocation28_spill]] %s3147_s19  ;;  %p3086_p3 = scmp.lt.s32.totalorder %s2085_s10, 4 }
  0x37   : > { %3150 = sst [smem:[#allocation29_spill]] %s3149_s20  ;;  %s2277_s13 = sshll.u32 %s2081_s9, 5 }
  0x38   : > { %s3151_s7 = scalar_select %p2271_p0, 1, 0 }
  0x39   : > { %s303_s5 = sand.u32 1, %s2085_s10   ;;  %s305_s17 = sand.u32 1, %s2053_s26  }
  0x3a   : > { %3152 = sst [smem:[#allocation30_spill]] %s3151_s7  ;;  %s1436_s18 = sshll.u32 %s305_s17, 7 }
  0x3b   : > { %s1490_s3 = sshll.u32 %s2077_s8, 4  ;;  %s307_s30 = scalar_lea.vmem [#allocation6], %s1436_s18 }
  0x3c   : > { %s314_s24 = sadd.s32 %s1490_s3, %s2277_s13  ;;  %s317_s19 = sshll.u32 %s307_s30, 4  ;;  %s318_s19 = int_to_ptr.vmem [resolvable:$true] %s317_s19 }
  0x3d   : > { %s1440_s25 = sshll.u32 %s314_s24, 7  ;;  %s3153_s1 = sld [smem:[#allocation50_spill]] }
  0x3e   : > { %p2290_p2 = pnand %p3086_p3, %p2255_p11  ;;  %s2090_s21 = smov [#allocation11]  }
  0x3f   : > { %s259_s22 = sshll.u32 %s2090_s21, 4  ;;  %s2294_s17 = scalar_lea.sflag [#allocation7], %s303_s5  ;;  %s260_s22 = int_to_ptr.vmem [resolvable:$true] %s259_s22 }
  0x40   : > { %p1821_p8 = pneg %p2290_p2  ;;  %s1832_s3 = scalar_lea.vmem %s318_s19, 2048 }
  0x41   : > { %p1833_p9 = scmp.ne.s32.totalorder %s318_s19, %s1832_s3  ;;  %s2091_s24 = smov [#allocation6]  }
  0x42   : > { %s1837_s2 = sshll.u32 %s2091_s24, 4  ;;  %s1838_s2 = int_to_ptr.vmem [resolvable:$false] %s1837_s2 }
  0x43   : > { %s316_s20 = scalar_lea.hbm %s3153_s1, %s1440_s25  ;;  %p1835_p10 = pnand %p1833_p9, %p1821_p8 }
  0x44   : > { %s1839_s25 = scalar_lea.vmem %s1838_s2, 4096  ;;  %p1840_p5 = scmp.lt.s32.totalorder %s318_s19, %s1838_s2 }
  0x45   : > { %p1836_p1 = pneg %p1835_p10  ;;  %p1841_p11 = scmp.lt.s32.totalorder %s1839_s25, %s1832_s3 }
  0x47   : > { %p1842_p3 = por %p1841_p11, %p1840_p5 }
  0x49   : > { %p1843_p7 = pnand %p1842_p3, %p1836_p1 }
  0x4b   : > { %1846 = shalt.err (!%p1843_p7)
}
  0x4c   : > { %s3155_s21 = smov 8   ;;  %s3156_s5 = smov 128  }
  0x4d   : > { %1650 = dma.hbm_to_vmem [thread:$0]  (!%p2290_p2), %s316_s20, 2048, %s318_s19, %s2294_s17, %s3156_s5, %s3156_s5, %s3155_s21  }
  0x4e   : > { %s1858_s30 = scalar_lea.vmem %s260_s22, 1024  ;;  %p3157_p9 = pneg %p2220_p6 }
  0x4f   : > { %p1859_p8 = scmp.ne.s32.totalorder %s260_s22, %s1858_s30  ;;  %p1866_p12 = scmp.lt.s32.totalorder %s260_s22, %s260_s22 }
  0x50   : > { %p1867_p13 = scmp.lt.s32.totalorder %s1858_s30, %s1858_s30 }
  0x51   : > { %p1861_p10 = pnand %p1859_p8, %p3157_p9 }
  0x52   : > { %p1868_p5 = por %p1867_p13, %p1866_p12 }
  0x53   : > { %p1862_p0 = pneg %p1861_p10 }
  0x55   : > { %p1869_p1 = pnand %p1868_p5, %p1862_p0 }
  0x57   : > { %1872 = shalt.err (!%p1869_p1)
}
  0x58   : > { %s2092_s12 = smov 64   ;;  %s2093_s7 = smov 4  }
  0x59   : > { %s3158_s4 = sld [smem:[#allocation53_spill]]  ;;  %p40_p7 = scmp.ge.s32.totalorder %s3249_s6, 2 }
  0x5a   : > { %s1420_s19 = sshll.u32 %s2077_s8, 3  ;;  %s1422_s3 = sshll.u32 %s3247_s16, 3 }
  0x5b   : > { %s1421_s20 = sadd.s32 4294967295, %s1420_s19  ;;  %s3251_s6 = smov (%p40_p7, %s3249_s6), 0 }
  0x5c   : > { %3159 = sst [smem:[#allocation31_spill]] %s3251_s6  ;;  %p44_p12 = scmp.gt.s32.totalorder %s1421_s20, 0 }
  0x5d   : > { %s1423_s15 = sadd.s32 4294967295, %s1422_s3  ;;  %s2320_s24 = ssub.s32 %s2081_s9, %s3251_s6 }
  0x5e   : > { %p48_p13 = scmp.gt.s32.totalorder %s1423_s15, 0  ;;  %s3253_s20 = smov (!%p44_p12, %s1421_s20), 0 }
  0x5f   : > { %1643 = dma.hbm_to_vmem [thread:$0]  (!%p2220_p6), %s3158_s4, 1024, %s260_s22, [#allocation10], %s2092_s12, %s2092_s12, %s2093_s7  }
  0x60   : > { %s3255_s15 = smov (!%p48_p13, %s1423_s15), 0  ;;  %s55_s22 = sadd.s32 1, %s2065_s29 }
  0x61   : > { %p62_p6 = scmp.ne.s32.totalorder %s2065_s29, %s2061_s28  ;;  %s51_s2 = ssub.s32 %s3253_s20, %s3255_s15 }
  0x62   : > { %p68_p0 = scmp.ne.s32.totalorder %s2061_s28, %s2057_s27  ;;  %s52_s25 = sor.u32 %s51_s2, %s2320_s24 }
  0x63   : > { %p3160_p3 = scmp.eq.s32.totalorder %s2085_s10, 0  ;;  %p53_p11 = scmp.eq.s32.totalorder %s52_s25, 0 }
  0x64   : > { %p3162_p8 = scmp.eq.s32.totalorder %s2206_s11, 0  ;;  %s3165_s7 = ssub.s32 %s2077_s8, %s3247_s16 }
  0x65   : > { %p2330_p2 = por %p3160_p3, %p62_p6  ;;  %s80_s18 = sor.u32 %s3165_s7, %s2320_s24 }
  0x66   : > { %p2336_p9 = por %p3162_p8, %p68_p0  ;;  %s2344_s14 = sadd.s32 8, %s1420_s19 }
  0x67   : > { %s2347_s27 = scalar_select %p53_p11, %s2065_s29, %s55_s22  }
  0x68   : > { %s3163_s12 = scalar_select %p2336_p9, 1, 0 }
  0x69   : > { %p81_p10 = scmp.eq.s32.totalorder %s80_s18, 0  ;;  %p108_p5 = scmp.lt.s32.totalorder %s2344_s14, 15 }
  0x6a   : > { %3164 = sst [smem:[#allocation32_spill]] %s3163_s12  ;;  %s2350_s15 = sadd.s32 8, %s1422_s3 }
  0x6b   : > { %s276_s2 = sand.u32 1, %s2065_s29   ;;  %s3166_s25 = sadd.s32 1, %s2053_s26 }
  0x6c   : > { %s2356_s1 = scalar_select %p81_p10, %s2053_s26, %s3166_s25  }
  0x6d   : > { %s1430_s4 = sshll.u32 %s276_s2, 4  ;;  %s1433_s6 = sshll.u32 %s3253_s20, 1 }
  0x6e   : > { %s290_s7 = sadd.s32 %s2277_s13, %s1433_s6  ;;  %s280_s16 = scalar_lea.vmem [#allocation3], %s1430_s4 }
  0x6f   : > { %s1435_s19 = sshll.u32 %s290_s7, 7  ;;  %s293_s9 = sshll.u32 %s280_s16, 4  ;;  %s294_s9 = int_to_ptr.vmem [resolvable:$true] %s293_s9 }
  0x70   : > { %s292_s22 = scalar_lea.hbm %s3062_s0, %s1435_s19  ;;  %p3167_p7 = scmp.lt.s32.totalorder %s2085_s10, 4 }
  0x71   : > { %s277_s18 = scalar_lea.sflag [#allocation4], %s276_s2  ;;  %s1886_s20 = scalar_lea.vmem %s294_s9, 256 }
  0x72   : > { %p2367_p12 = pnand %p3167_p7, %p2330_p2  ;;  %p1887_p6 = scmp.ne.s32.totalorder %s294_s9, %s1886_s20 }
  0x73   : > { %s2094_s4 = smov [#allocation3]  }
  0x74   : > { %p1875_p13 = pneg %p2367_p12  ;;  %s1891_s6 = sshll.u32 %s2094_s4, 4  ;;  %s1892_s6 = int_to_ptr.vmem [resolvable:$false] %s1891_s6 }
  0x75   : > { %s1893_s8 = scalar_lea.vmem %s1892_s6, 512  ;;  %p1894_p11 = scmp.lt.s32.totalorder %s294_s9, %s1892_s6 }
  0x76   : > { %p1889_p0 = pnand %p1887_p6, %p1875_p13  ;;  %p1895_p8 = scmp.lt.s32.totalorder %s1893_s8, %s1886_s20 }
  0x78   : > { %p1890_p3 = pneg %p1889_p0  ;;  %p1896_p10 = por %p1895_p8, %p1894_p11 }
  0x7a   : > { %p1897_p1 = pnand %p1896_p10, %p1890_p3 }
  0x7c   : > { %1900 = shalt.err (!%p1897_p1)
}
  0x7d   : > { %s3169_s16 = sld [smem:[#allocation19_spill]]  ;;  %s3257_s14 = smov (!%p108_p5, %s2344_s14), 15 }
  0x7e   : > { %s3170_s30 = sld [smem:[#allocation18_spill]]  ;;  %p3171_p2 = scmp.lt.s32.totalorder %s2350_s15, 15 }
  0x7f   : > { %1647 = dma.hbm_to_vmem [thread:$0]  (!%p2367_p12), %s292_s22, 256, %s294_s9, %s277_s18, %s3156_s5, %s3156_s5, %s3155_s21  }
  0x80   : > { %s3259_s15 = smov (!%p3171_p2, %s2350_s15), 15  ;;  %s119_s12 = sadd.s32 1, %s2041_s23 }
  0x81   : > { %s115_s2 = ssub.s32 %s3257_s14, %s3259_s15  ;;  %p3172_p13 = scmp.eq.s32.totalorder %s2085_s10, 0 }
  0x82   : > { %s116_s25 = sor.u32 %s115_s2, %s2320_s24  ;;  %p3174_p3 = scmp.eq.s32.totalorder %s2206_s11, 0 }
  0x83   : > { %p126_p1 = scmp.ne.s32.totalorder %s2041_s23, %s3169_s16  ;;  %p117_p0 = scmp.eq.s32.totalorder %s116_s25, 0 }
  0x84   : > { %p132_p7 = scmp.ne.s32.totalorder %s3169_s16, %s3170_s30  ;;  %s329_s19 = sand.u32 1, %s2041_s23  }
  0x85   : > { %p2392_p6 = por %p126_p1, %p3172_p13  ;;  %s1443_s22 = sshll.u32 %s3257_s14, 1 }
  0x86   : > { %p2398_p11 = por %p132_p7, %p3174_p3  ;;  %s1441_s15 = sshll.u32 %s329_s19, 4 }
  0x87   : > { %s2404_s3 = scalar_select %p117_p0, %s2041_s23, %s119_s12  }
  0x88   : > { %s341_s18 = sadd.s32 %s1443_s22, %s2277_s13  ;;  %s3176_s6 = sld [smem:[#allocation51_spill]] }
  0x89   : > { %s1445_s20 = sshll.u32 %s341_s18, 7  ;;  %s331_s16 = scalar_lea.vmem [#allocation8], %s1441_s15 }
  0x8a   : > { %s344_s30 = sshll.u32 %s331_s16, 4  ;;  %p3177_p5 = scmp.lt.s32.totalorder %s2085_s10, 4  ;;  %s345_s30 = int_to_ptr.vmem [resolvable:$true] %s344_s30 }
  0x8b   : > { %s1914_s14 = scalar_lea.vmem %s345_s30, 256  ;;  %s2095_s13 = smov [#allocation8]  }
  0x8c   : > { %p2414_p12 = pnand %p3177_p5, %p2392_p6  ;;  %p1915_p10 = scmp.ne.s32.totalorder %s345_s30, %s1914_s14 }
  0x8d   : > { %s1919_s12 = sshll.u32 %s2095_s13, 4  ;;  %s1920_s12 = int_to_ptr.vmem [resolvable:$false] %s1919_s12 }
  0x8e   : > { %s343_s8 = scalar_lea.hbm %s3176_s6, %s1445_s20  ;;  %p1903_p8 = pneg %p2414_p12 }
  0x8f   : > { %s1921_s25 = scalar_lea.vmem %s1920_s12, 512  ;;  %p1922_p7 = scmp.lt.s32.totalorder %s345_s30, %s1920_s12 }
  0x90   : > { %p1917_p2 = pnand %p1915_p10, %p1903_p8  ;;  %p1923_p13 = scmp.lt.s32.totalorder %s1921_s25, %s1914_s14 }
  0x92   : > { %p1918_p1 = pneg %p1917_p2  ;;  %p1924_p0 = por %p1923_p13, %p1922_p7 }
  0x94   : > { %p1925_p3 = pnand %p1924_p0, %p1918_p1 }
  0x96   : > { %1928 = shalt.err (!%p1925_p3)
}
  0x97   : > { %1653 = dma.hbm_to_vmem [thread:$0]  (!%p2414_p12), %s343_s8, 256, %s345_s30, %s2294_s17, %s3156_s5, %s3156_s5, %s3155_s21  }
  0x98   : > { %356 = sbr.rel (%p2212_p4) target bundleno = 502 (0x1f6), region = 44 }
  0x9d   : > { %s358_s22 = sand.u32 1, %s2061_s28  }
  0x9e   : > { %s2429_s15 = sshll.u32 %s358_s22, 4  ;;  %s359_s18 = scalar_lea.sflag [#allocation4], %s358_s22 }
  0x9f   : > { %s362_s20 = scalar_lea.vmem [#allocation3], %s2429_s15 }
  0xa0   : > { %2012 = dma.done.wait (%p2336_p9), %s359_s18, 256  }
  0xa1   : > { %2014 = vsyncadd (%p2336_p9), %s359_s18, 4294967040  ;;  %s3181_s24 = sld [smem:[#allocation21_spill]]  ;;  %s367_s17 = sand.u32 1, %s2206_s11  }
  0xa2   : > { %s3182_s4 = sld [smem:[#allocation29_spill]]  ;;  %s368_s6 = scalar_lea.sflag [#allocation7], %s367_s17 }
  0xa7   : > { %s2438_s21 = sand.u32 1, %s3181_s24  }
  0xa8   : > { %s1448_s5 = sshll.u32 %s2438_s21, 7  ;;  %p3183_p4 = scmp.ne.s32.totalorder %s3182_s4, 0 }
  0xa9   : > { %s2441_s8 = scalar_lea.vmem [#allocation6], %s1448_s5 }
  0xaa   : > { %2016 = dma.done.wait (%p3183_p4), %s368_s6, 2048  }
  0xab   : > { %2018 = vsyncadd (%p3183_p4), %s368_s6, 4294965248  ;;  %s3184_s16 = sld [smem:[#allocation19_spill]] }
  0xb1   : > { %s378_s30 = sand.u32 1, %s3184_s16  }
  0xb2   : > { %s2448_s2 = sshll.u32 %s378_s30, 4 }
  0xb3   : > { %s380_s14 = scalar_lea.vmem [#allocation8], %s2448_s2 }
  0xb4   : > { %2020 = dma.done.wait (%p2398_p11), %s368_s6, 256  }
  0xb5   : > { %2022 = vsyncadd (%p2398_p11), %s368_s6, 4294967040  ;;  %p3185_p9 = scmp.eq.s32.totalorder %s2206_s11, 0 }
  0xb7   : > { %2024 = dma.done.wait (%p3185_p9), [#allocation10], 1280   ;;  %p3186_p6 = pmov %p3185_p9 }
  0xb8   : > { %v2096_v0 = vmov 0.0   ;;  %s3187_s13 = sld [smem:[#allocation22_spill]]  ;;  %v550_v1 = vlaneseq  ;;  %v1785_v2 = vld [vmem:[#allocation11 + $0x38] sm:$0xff]   ;;  %v1786_v3 = vld [vmem:[#allocation11 + $0x30] sm:$0xff]   ;;  %v1787_v5 = vld [vmem:[#allocation11 + $0x28] sm:$0xff]   ;;  %s1452_s15 = sshll.u32 %s2438_s21, 6 }
  0xb9   : > { %2026 = vsyncadd (%p3186_p6), [#allocation10], 4294966016  ;;  %438 = vst [vmem:[#allocation2] sm:$0x1] %v2096_v0  ;;  %1573 = vmatprep.subr.bf16.mxu0 %v1785_v2  ;;  %1605 = vmatprep.subr.bf16.mxu1 %v1785_v2  ;;  %v1788_v10 = vld [vmem:[#allocation11 + $0x20] sm:$0xff]   ;;  %v458_v12 = vld [vmem:[%s2441_s8] sm:$0xff] }
  0xba   : > { %439 = vst [vmem:[#allocation2 + $0x18] sm:$0x1] %v2096_v0  ;;  %440 = vst [vmem:[#allocation2 + $0x30] sm:$0x1] %v2096_v0  ;;  %v551_v4 = vshrl.u32 %v550_v1, 7  ;;  %1574 = vmatpush3.bf16.msra.mxu0 %v1785_v2  ;;  %1613 = vmatpush3.bf16.msra.mxu1 %v1785_v2  ;;  %v459_v13 = vld [vmem:[%s2441_s8 + $0x8] sm:$0xff] }
  0xbb   : > { %448 = vst [vmem:[#allocation2 + $0x11] sm:$0x1] %v2096_v0  ;;  %449 = vst [vmem:[#allocation2 + $0x29] sm:$0x1] %v2096_v0  ;;  %1575 = vmatprep.subr.bf16.mxu0 %v1786_v3  ;;  %1606 = vmatprep.subr.bf16.mxu1 %v1786_v3  ;;  %v460_v14 = vld [vmem:[%s2441_s8 + $0x10] sm:$0xff]  ;;  %v461_v18 = vld [vmem:[%s2441_s8 + $0x18] sm:$0xff] }
  0xbc   : > { %450 = vst [vmem:[#allocation2 + $0x41] sm:$0x1] %v2096_v0  ;;  %441 = vst [vmem:[#allocation2 + $0x48] sm:$0x1] %v2096_v0  ;;  %v552_v6 = vsub.s32 0, %v551_v4  ;;  %v588_v7 = vsub.s32 1, %v551_v4 }
  0xbd   : > { %442 = vst [vmem:[#allocation2 + $0x60] sm:$0x1] %v2096_v0  ;;  %443 = vst [vmem:[#allocation2 + $0x78] sm:$0x1] %v2096_v0  ;;  %v640_v8 = vsub.s32 2, %v551_v4  ;;  %v692_v9 = vsub.s32 3, %v551_v4 }
  0xbe   : > { %444 = vst [vmem:[#allocation2 + $0x90] sm:$0x1] %v2096_v0  ;;  %445 = vst [vmem:[#allocation2 + $0xa8] sm:$0x1] %v2096_v0  ;;  %p507_p11 = scmp.gt.s32.totalorder %s3187_s13, 0  ;;  %1576 = vmatpush3.bf16.msra.mxu0 %v1786_v3  ;;  %1614 = vmatpush3.bf16.msra.mxu1 %v1786_v3  ;;  %v744_v11 = vsub.s32 4, %v551_v4 }
  0xbf   : > { %446 = vst [vmem:[#allocation2 + $0xc0] sm:$0x1] %v2096_v0  ;;  %447 = vst [vmem:[#allocation2 + $0xd8] sm:$0x1] %v2096_v0  ;;  %1577 = vmatprep.subr.bf16.mxu0 %v1787_v5  ;;  %1607 = vmatprep.subr.bf16.mxu1 %v1787_v5  ;;  %v796_v15 = vsub.s32 5, %v551_v4  ;;  %v849_v16 = vsub.s32 6, %v551_v4 }
  0xc0   : > { %451 = vst [vmem:[#allocation2 + $0x59] sm:$0x1] %v2096_v0  ;;  %452 = vst [vmem:[#allocation2 + $0x71] sm:$0x1] %v2096_v0  ;;  %s2460_s11 = scalar_select %p507_p11, 1, 0 }
  0xc1   : > { %453 = vst [vmem:[#allocation2 + $0x89] sm:$0x1] %v2096_v0  ;;  %454 = vst [vmem:[#allocation2 + $0xa1] sm:$0x1] %v2096_v0  ;;  %v901_v17 = vsub.s32 7, %v551_v4  ;;  %v2467_v19 = vmax.f32 %v458_v12, 0.0 }
  0xc2   : > { %455 = vst [vmem:[#allocation2 + $0xb9] sm:$0x1] %v2096_v0  ;;  %456 = vst [vmem:[#allocation2 + $0xd1] sm:$0x1] %v2096_v0  ;;  %s509_s9 = scvt.s32.f32 %s2460_s11  ;;  %v2469_v20 = vmax.f32 %v459_v13, 0.0  ;;  %v2471_v21 = vmax.f32 %v460_v14, 0.0  ;;  %1578 = vmatpush3.bf16.msra.mxu0 %v1787_v5  ;;  %1615 = vmatpush3.bf16.msra.mxu1 %v1787_v5 }
  0xc3   : > { %457 = vst [vmem:[#allocation2 + $0xe9] sm:$0x1] %v2096_v0  ;;  %v513_v22 = vld [vmem:[%s362_s20] sm:$0xff]  ;;  %v514_v23 = vld [vmem:[%s362_s20 + $0x8] sm:$0xff]  ;;  %v2477_v25 = vmax.f32 %v461_v18, 0.0  ;;  %491 = vst [vmem:[#allocation2 + $0x19] sm:$0xff] %v2467_v19  ;;  %1579 = vmatprep.subr.bf16.mxu0 %v1788_v10  ;;  %1608 = vmatprep.subr.bf16.mxu1 %v1788_v10 }
  0xc4   : > { %v517_v24 = vstv %s509_s9  ;;  %v515_v26 = vmax.f32 %v513_v22, 0.0  ;;  %v516_v27 = vmax.f32 %v514_v23, 0.0  ;;  %v532_v28 = vld [vmem:[#allocation9] sm:$0xff]  ;;  %492 = vst [vmem:[#allocation2 + $0x21] sm:$0xff] %v2469_v20  ;;  %493 = vst [vmem:[#allocation2 + $0x31] sm:$0xff] %v2471_v21  ;;  %v464_v32 = vld [vmem:[%s2441_s8 + $0x30] sm:$0xff] }
  0xc5   : > { %v2482_v29 = vrot.slane %v532_v28, %v552_v6  ;;  %v2484_v30 = vrot.slane %v532_v28, %v588_v7  ;;  %v2486_v31 = vrot.slane %v532_v28, %v640_v8  ;;  %v465_v33 = vld [vmem:[%s2441_s8 + $0x38] sm:$0xff]  ;;  %v466_v34 = vld [vmem:[%s2441_s8 + $0x40] sm:$0xff]  ;;  %v1789_v35 = vld [vmem:[#allocation11 + $0x18] sm:$0xff]   ;;  %494 = vst [vmem:[#allocation2 + $0x39] sm:$0xff] %v2477_v25  ;;  %v2492_v38 = vrot.slane %v532_v28, %v692_v9  ;;  %p510_p5 = scmp.lt.s32.totalorder %s3187_s13, 1  ;;  %s3223_s22 = sld [smem:[#allocation54_spill]] }
  0xc6   : > { %v518_v36 = vmul.f32 %v517_v24, %v515_v26  ;;  %v519_v37 = vmul.f32 %v517_v24, %v516_v27  ;;  %v467_v39 = vld [vmem:[%s2441_s8 + $0x48] sm:$0xff]  ;;  %v2495_v40 = vmax.f32 %v464_v32, 0.0  ;;  %v2497_v41 = vrot.slane %v532_v28, %v744_v11  ;;  %v468_v45 = vld [vmem:[%s2441_s8 + $0x50] sm:$0xff]  ;;  %v469_v46 = vld [vmem:[%s2441_s8 + $0x58] sm:$0xff]  ;;  %1580 = vmatpush3.bf16.msra.mxu0 %v1788_v10  ;;  %1616 = vmatpush3.bf16.msra.mxu1 %v1788_v10  ;;  %s2967_s18 = scalar_lea.vmem [#allocation12], %s1452_s15  ;;  %s3224_s20 = sld [smem:[#allocation23_spill]] }
  0xc7   : > { %v2499_v42 = vrot.slane %v532_v28, %v796_v15  ;;  %v2501_v43 = vrot.slane %v532_v28, %v849_v16  ;;  %v2503_v44 = vrot.slane %v532_v28, %v901_v17  ;;  %v2513_v49 = vmax.f32 %v465_v33, 0.0  ;;  %v462_v51 = vld [vmem:[%s2441_s8 + $0x20] sm:$0xff]  ;;  %v463_v56 = vld [vmem:[%s2441_s8 + $0x28] sm:$0xff]  ;;  %1581 = vmatprep.subr.bf16.mxu0 %v1789_v35  ;;  %1609 = vmatprep.subr.bf16.mxu1 %v1789_v35  ;;  %v2567_v5 = vld [vmem:[#allocation11 + $0x8] sm:$0xff]   ;;  %s2660_s12 = scalar_select %p510_p5, 1, 0 }
  0xc8   : > { %3188 = vst [vmem:[#allocation33_spill] sm:$0xff] %v2495_v40  ;;  %520 = vst [vmem:[#allocation2 + $0x1] sm:$0xff] %v518_v36  ;;  %v2508_v47 = vmul.f32 %v2484_v30, %v518_v36  ;;  %v2511_v48 = vmul.f32 %v2484_v30, %v519_v37  ;;  %v2515_v50 = vmax.f32 %v466_v34, 0.0  ;;  %v2521_v52 = vmul.f32 %v2497_v41, %v2467_v19  ;;  %v1790_v57 = vld [vmem:[#allocation11 + $0x10] sm:$0xff]   ;;  %v2549_v63 = vld [vmem:[#allocation9 + $0x8] ss:$0 sm:$0xff] }
  0xc9   : > { %521 = vst [vmem:[#allocation2 + $0x9] sm:$0xff] %v519_v37  ;;  %3189 = vst [vmem:[#allocation34_spill] sm:$0xff] %v2513_v49  ;;  %v2525_v53 = vmul.f32 %v2497_v41, %v2469_v20  ;;  %v2529_v54 = vmul.f32 %v2503_v44, %v2471_v21  ;;  %v2531_v55 = vmax.f32 %v467_v39, 0.0  ;;  %v2536_v58 = vmul.f32 %v2503_v44, %v2477_v25  ;;  %v470_v62 = vld [vmem:[%s2441_s8 + $0x60] sm:$0xff]  ;;  %v471_v4 = vld [vmem:[%s2441_s8 + $0x68] sm:$0xff]  ;;  %s512_s25 = scvt.s32.f32 %s2660_s12  ;;  %s1509_s24 = sshll.u32 %s3187_s13, 4 }
  0xca   : > { %497 = vst [vmem:[#allocation2 + $0x61] sm:$0xff] %v2495_v40  ;;  %v2538_v59 = vmax.f32 %v468_v45, 0.0  ;;  %v2540_v60 = vmax.f32 %v469_v46, 0.0  ;;  %498 = vst [vmem:[#allocation2 + $0x69] sm:$0xff] %v2513_v49  ;;  %v2546_v61 = vmul.f32 %v2484_v30, %v2495_v40  ;;  %v2554_v0 = vmul.f32 %v2484_v30, %v2513_v49  ;;  %v674_v6 = vld [vmem:[#allocation2 + $0x18] sm:$0xff]  ;;  %v472_v13 = vld [vmem:[%s2441_s8 + $0x70] sm:$0xff]  ;;  %1582 = vmatpush3.bf16.msra.mxu0 %v1789_v35 }
  0xcb   : > { %3190 = vst [vmem:[#allocation35_spill] sm:$0xff] %v2531_v55  ;;  %499 = vst [vmem:[#allocation2 + $0x79] sm:$0xff] %v2515_v50  ;;  %v2558_v1 = vmul.f32 %v2497_v41, %v2515_v50  ;;  %v2562_v2 = vmul.f32 %v2497_v41, %v2531_v55  ;;  %v2564_v3 = vmax.f32 %v462_v51, 0.0  ;;  %v675_v7 = vld [vmem:[#allocation2 + $0x20] sm:$0xff]  ;;  %v2581_v11 = vmax.f32 %v463_v56, 0.0  ;;  %1617 = vmatpush3.bf16.msra.mxu1 %v1789_v35  ;;  %v2598_v18 = vld [vmem:[#allocation2 + $0x30] sm:$0xff] }
  0xcc   : > { %3191 = vst [vmem:[#allocation36_spill] sm:$0xff] %v2538_v59  ;;  %3192 = vst [vmem:[#allocation37_spill] sm:$0xff] %v2540_v60  ;;  %v2569_v8 = vld [vmem:[#allocation2 + $0x1a] sm:$0xff]  ;;  %v2575_v9 = vmul.f32 %v2503_v44, %v2538_v59  ;;  %v2579_v10 = vmul.f32 %v2503_v44, %v2540_v60  ;;  %v592_v12 = vmul.f32 %v2484_v30, %v2467_v19  ;;  %v2592_v16 = vld [vmem:[#allocation2 + $0x22] sm:$0xff]  ;;  %v2603_v19 = vmax.f32 %v470_v62, 0.0  ;;  %s1482_s4 = sshll.u32 %s3224_s20, 5 }
  0xcd   : > { %500 = vst [vmem:[#allocation2 + $0x81] sm:$0xff] %v2531_v55  ;;  %501 = vst [vmem:[#allocation2 + $0x91] sm:$0xff] %v2538_v59  ;;  %v2587_v14 = vmul.f32 %v2492_v38, %v674_v6  ;;  %v2590_v15 = vmul.f32 %v2492_v38, %v675_v7  ;;  %v2596_v17 = vmul.f32 %v2499_v42, %v2569_v8  ;;  %v2600_v22 = vld [vmem:[#allocation2 + $0x38] sm:$0xff]  ;;  %1583 = vmatprep.subr.bf16.mxu0 %v1790_v57  ;;  %v473_v33 = vld [vmem:[%s2441_s8 + $0x78] sm:$0xff]  ;;  %s1257_s17 = sadd.s32 %s1509_s24, %s1482_s4  ;;  %s1260_s5 = sshll.u32 %s2967_s18, 4  ;;  %s2978_s5 = int_to_ptr.vmem [resolvable:$true] %s1260_s5 }
  0xce   : > { %502 = vst [vmem:[#allocation2 + $0x99] sm:$0xff] %v2540_v60  ;;  %495 = vst [vmem:[#allocation2 + $0x49] sm:$0xff] %v2564_v3  ;;  %1610 = vmatprep.subr.bf16.mxu1 %v1790_v57  ;;  %v2608_v23 = vmul.f32 %v2499_v42, %v2592_v16  ;;  %v2612_v24 = vmul.f32 %v2501_v43, %v2598_v18  ;;  %v2616_v26 = vmul.f32 %v2501_v43, %v2600_v22  ;;  %v2618_v27 = vld [vmem:[#allocation2 + $0x32] sm:$0xff]  ;;  %v2620_v28 = vld [vmem:[#allocation2 + $0x3a] sm:$0xff]  ;;  %s3225_s6 = sld [smem:[#allocation28_spill]]  ;;  %s1483_s8 = sshll.u32 %s1257_s17, 6 }
  0xcf   : > { %3193 = vst [vmem:[#allocation38_spill] sm:$0xff] %v2603_v19  ;;  %496 = vst [vmem:[#allocation2 + $0x51] sm:$0xff] %v2581_v11  ;;  %v2623_v32 = vmax.f32 %v471_v4, 0.0  ;;  %v534_v34 = vld [vmem:[#allocation2] sm:$0xff]  ;;  %v2628_v37 = vmul.f32 %v2549_v63, %v2618_v27  ;;  %v2632_v39 = vmul.f32 %v2549_v63, %v2620_v28  ;;  %v556_v45 = vmul.f32 %v674_v6, %v2482_v29  ;;  %s3226_s2 = sld [smem:[#allocation55_spill]]  ;;  %s1244_s13 = scalar_lea.sflag [#allocation5], %s2438_s21 }
  0xd0   : > { %v535_v35 = vld [vmem:[#allocation2 + $0x8] sm:$0xff]  ;;  %v2636_v46 = vmul.f32 %v675_v7, %v2482_v29  ;;  %503 = vst [vmem:[#allocation2 + $0xa9] sm:$0xff] %v2603_v19  ;;  %v554_v51 = vmul.f32 %v2482_v29, %v534_v34  ;;  %v593_v40 = vmul.f32 %v2484_v30, %v2469_v20  ;;  %1584 = vmatpush3.bf16.msra.mxu0 %v1790_v57  ;;  %v2656_v60 = vmax.f32 %v472_v13, 0.0  ;;  %v1792_v20 = vld [vmem:[#allocation11] sm:$0xff]   ;;  %s1929_s11 = scalar_lea.vmem %s2978_s5, 1024  ;;  %s2097_s9 = smov [#allocation12]  }
  0xd1   : > { %3194 = vst [vmem:[#allocation39_spill] sm:$0xff] %v2623_v32  ;;  %v622_v36 = vld [vmem:[#allocation2 + $0x2] sm:$0xff]  ;;  %v555_v56 = vmul.f32 %v2482_v29, %v535_v35  ;;  %v623_v62 = vld [vmem:[#allocation2 + $0xa] sm:$0xff]  ;;  %504 = vst [vmem:[#allocation2 + $0xb1] sm:$0xff] %v2623_v32  ;;  %1618 = vmatpush3.bf16.msra.mxu1 %v1790_v57  ;;  %1585 = vmatprep.subr.bf16.mxu0 %v2567_v5  ;;  %p1930_p12 = scmp.ne.s32.totalorder %s2978_s5, %s1929_s11  ;;  %s1933_s12 = sshll.u32 %s2097_s9, 4  ;;  %s1934_s12 = int_to_ptr.vmem [resolvable:$false] %s1933_s12 }
  0xd2   : > { %v642_v4 = vmul.f32 %v2486_v31, %v622_v36  ;;  %v2642_v49 = vld [vmem:[#allocation2 + $0x60] sm:$0xff]  ;;  %v643_v6 = vmul.f32 %v2486_v31, %v623_v62  ;;  %v2648_v7 = vld [vmem:[#allocation2 + $0x68] sm:$0xff]  ;;  %v608_v36 = vadd.f32 %v592_v12, %v556_v45  ;;  %3199 = vst [vmem:[#allocation44_spill] sm:$0xff] %v2656_v60  ;;  %1611 = vmatprep.subr.bf16.mxu1 %v2567_v5  ;;  %v2668_v32 = vld [vmem:[#allocation2 + $0x78] sm:$0xff]  ;;  %v2670_v12 = vmax.f32 %v473_v33, 0.0  ;;  %p1936_p1 = scmp.lt.s32.totalorder %s2978_s5, %s1934_s12 }
  0xd3   : > { %3195 = vst [vmem:[#allocation40_spill] sm:$0xff] %v2642_v49  ;;  %3196 = vst [vmem:[#allocation41_spill] sm:$0xff] %v2648_v7  ;;  %v562_v34 = vmul.f32 %v2482_v29, %v2642_v49  ;;  %v2652_v35 = vld [vmem:[#allocation2 + $0x62] sm:$0xff]  ;;  %v2654_v19 = vld [vmem:[#allocation2 + $0x6a] sm:$0xff]  ;;  %v606_v57 = vadd.f32 %v2508_v47, %v554_v51  ;;  %v607_v62 = vadd.f32 %v2511_v48, %v555_v56 }
  0xd4   : > { %3197 = vst [vmem:[#allocation42_spill] sm:$0xff] %v2652_v35  ;;  %3198 = vst [vmem:[#allocation43_spill] sm:$0xff] %v2654_v19  ;;  %v563_v49 = vmul.f32 %v2482_v29, %v2648_v7  ;;  %v650_v45 = vmul.f32 %v2486_v31, %v2652_v35  ;;  %v651_v59 = vmul.f32 %v2486_v31, %v2654_v19  ;;  %v2677_v55 = vld [vmem:[#allocation2 + $0x80] sm:$0xff]  ;;  %1586 = vmatpush3.bf16.msra.mxu0 %v2567_v5  ;;  %p3227_p8 = scmp.ne.s32.totalorder %s3225_s6, 0 }
  0xd5   : > { %3200 = vst [vmem:[#allocation45_spill] sm:$0xff] %v2670_v12  ;;  %v614_v13 = vadd.f32 %v2546_v61, %v562_v34  ;;  %v702_v47 = vmul.f32 %v2492_v38, %v2668_v32  ;;  %505 = vst [vmem:[#allocation2 + $0xc1] sm:$0xff] %v2656_v60  ;;  %v658_v48 = vadd.f32 %v642_v4, %v606_v57  ;;  %v2685_v56 = vld [vmem:[#allocation2 + $0x7a] sm:$0xff]  ;;  %v2687_v34 = vld [vmem:[#allocation2 + $0x82] sm:$0xff]  ;;  %1619 = vmatpush3.bf16.msra.mxu1 %v2567_v5 }
  0xd6   : > { %v659_v51 = vadd.f32 %v643_v6, %v607_v62  ;;  %v615_v33 = vadd.f32 %v2554_v0, %v563_v49  ;;  %v703_v61 = vmul.f32 %v2492_v38, %v2677_v55  ;;  %3201 = vst [vmem:[#allocation46_spill] sm:$0xff] %v2685_v56  ;;  %3202 = vst [vmem:[#allocation47_spill] sm:$0xff] %v2687_v34  ;;  %1587 = vmatprep.subr.bf16.mxu0 %v1792_v20  ;;  %v2699_v62 = vld [vmem:[#allocation2 + $0x90] sm:$0xff]  ;;  %v2709_v35 = vld [vmem:[#allocation2 + $0x9a] sm:$0xff]  ;;  %p1931_p10 = pnand %p1930_p12, %p3227_p8 }
  0xd7   : > { %506 = vst [vmem:[#allocation2 + $0xc9] sm:$0xff] %v2670_v12  ;;  %v666_v19 = vadd.f32 %v650_v45, %v614_v13  ;;  %v806_v4 = vmul.f32 %v2499_v42, %v2685_v56  ;;  %v807_v49 = vmul.f32 %v2499_v42, %v2687_v34  ;;  %1612 = vmatprep.subr.bf16.mxu1 %v1792_v20  ;;  %v2701_v12 = vld [vmem:[#allocation2 + $0x98] sm:$0xff]  ;;  %v2721_v7 = vstv %s512_s25  ;;  %s1935_s25 = scalar_lea.vmem %s1934_s12, 2048 }
  0xd8   : > { %v710_v0 = vadd.f32 %v2587_v14, %v658_v48  ;;  %v711_v6 = vadd.f32 %v2590_v15, %v659_v51  ;;  %v667_v57 = vadd.f32 %v651_v59, %v615_v33  ;;  %v2703_v5 = vld [vmem:[#allocation2 + $0x92] sm:$0xff]  ;;  %v859_v45 = vmul.f32 %v2501_v43, %v2699_v62  ;;  %1588 = vmatpush3.bf16.msra.mxu0 %v1792_v20  ;;  %p1932_p2 = pneg %p1931_p10  ;;  %p1937_p7 = scmp.lt.s32.totalorder %s1935_s25, %s1929_s11 }
  0xd9   : > { %3203 = vst [vmem:[#allocation48_spill] sm:$0xff] %v2703_v5  ;;  %v718_v13 = vadd.f32 %v702_v47, %v666_v19  ;;  %v860_v60 = vmul.f32 %v2501_v43, %v2701_v12  ;;  %v963_v14 = vmul.f32 %v2549_v63, %v2703_v5  ;;  %v964_v51 = vmul.f32 %v2549_v63, %v2709_v35 }
  0xda   : > { %v762_v59 = vadd.f32 %v2521_v52, %v710_v0  ;;  %v763_v15 = vadd.f32 %v2525_v53, %v711_v6  ;;  %v719_v48 = vadd.f32 %v703_v61, %v667_v57  ;;  %1620 = vmatpush3.bf16.msra.mxu1 %v1792_v20  ;;  %v609_v47 = vadd.f32 %v593_v40, %v2636_v46  ;;  %p1938_p13 = por %p1937_p7, %p1936_p1 }
  0xdb   : > { %v770_v19 = vadd.f32 %v2558_v1, %v718_v13  ;;  %v644_v33 = vmul.f32 %v2569_v8, %v2486_v31  ;;  %3204 = vst [vmem:[#allocation49_spill] sm:$0xff] %v2721_v7  ;;  %v645_v61 = vmul.f32 %v2592_v16, %v2486_v31  ;;  %v696_v1 = vmul.f32 %v2598_v18, %v2492_v38  ;;  %v3216_v7 = vld [vmem:[#allocation43_spill] sm:$0xff] }
  0xdc   : > { %v814_v5 = vadd.f32 %v2596_v17, %v762_v59  ;;  %v815_v52 = vadd.f32 %v2608_v23, %v763_v15  ;;  %v771_v53 = vadd.f32 %v2562_v2, %v719_v48  ;;  %v697_v40 = vmul.f32 %v2600_v22, %v2492_v38  ;;  %p1939_p0 = pnand %p1938_p13, %p1932_p2 }
  0xdd   : > { %v822_v0 = vadd.f32 %v806_v4, %v770_v19  ;;  %v660_v20 = vadd.f32 %v644_v33, %v608_v36  ;;  %v661_v6 = vadd.f32 %v645_v61, %v609_v47  ;;  %v748_v2 = vmul.f32 %v2497_v41, %v2471_v21  ;;  %v2748_v19 = vld [vmem:[#allocation2 + $0x48] sm:$0xff]  ;;  %v2760_v61 = vld [vmem:[#allocation2 + $0x52] sm:$0xff] }
  0xde   : > { %v867_v8 = vadd.f32 %v2612_v24, %v814_v5  ;;  %v868_v46 = vadd.f32 %v2616_v26, %v815_v52  ;;  %v823_v17 = vadd.f32 %v807_v49, %v771_v53  ;;  %v749_v16 = vmul.f32 %v2497_v41, %v2477_v25 }
  0xdf   : > { %v875_v23 = vadd.f32 %v859_v45, %v822_v0  ;;  %v712_v57 = vadd.f32 %v696_v1, %v660_v20  ;;  %v713_v59 = vadd.f32 %v697_v40, %v661_v6  ;;  %v800_v26 = vmul.f32 %v2618_v27, %v2499_v42 }
  0xe0   : > { %v919_v36 = vadd.f32 %v2529_v54, %v867_v8  ;;  %v920_v4 = vadd.f32 %v2536_v58, %v868_v46  ;;  %v876_v13 = vadd.f32 %v860_v60, %v823_v17  ;;  %v801_v49 = vmul.f32 %v2620_v28, %v2499_v42  ;;  %v2750_v58 = vld [vmem:[#allocation2 + $0x50] sm:$0xff] }
  0xe1   : > { %v927_v24 = vadd.f32 %v2575_v9, %v875_v23  ;;  %v764_v5 = vadd.f32 %v748_v2, %v712_v57  ;;  %v765_v54 = vadd.f32 %v749_v16, %v713_v59  ;;  %v853_v47 = vmul.f32 %v2501_v43, %v2748_v19  ;;  %v3205_v23 = vld [vmem:[#allocation35_spill] sm:$0xff] }
  0xe2   : > { %v971_v45 = vadd.f32 %v2628_v37, %v919_v36  ;;  %v972_v15 = vadd.f32 %v2632_v39, %v920_v4  ;;  %v928_v48 = vadd.f32 %v2579_v10, %v876_v13  ;;  %v854_v33 = vmul.f32 %v2501_v43, %v2750_v58  ;;  %v2758_v10 = vld [vmem:[#allocation2 + $0x4a] sm:$0xff] }
  0xe3   : > { %v979_v60 = vadd.f32 %v963_v14, %v927_v24  ;;  %v816_v9 = vadd.f32 %v800_v26, %v764_v5  ;;  %v817_v37 = vadd.f32 %v801_v49, %v765_v54  ;;  %v905_v39 = vmul.f32 %v2503_v44, %v2564_v3  ;;  %v3206_v26 = vld [vmem:[#allocation36_spill] sm:$0xff] }
  0xe4   : > { %v987_v52 = vpack.c.bf16 %v972_v15, %v971_v45  ;;  %v980_v53 = vadd.f32 %v964_v51, %v928_v48  ;;  %v906_v14 = vmul.f32 %v2503_v44, %v2581_v11  ;;  %v957_v20 = vmul.f32 %v2549_v63, %v2758_v10  ;;  %v3207_v15 = vld [vmem:[#allocation37_spill] sm:$0xff]  ;;  %v3208_v54 = vld [vmem:[#allocation48_spill] sm:$0xff] }
  0xe5   : > { %v869_v0 = vadd.f32 %v853_v47, %v816_v9  ;;  %v958_v1 = vmul.f32 %v2549_v63, %v2760_v61  ;;  %v870_v40 = vadd.f32 %v854_v33, %v817_v37  ;;  %v564_v8 = vmul.f32 %v2668_v32, %v2482_v29  ;;  %v2792_v47 = vld [vmem:[#allocation2 + $0xa8] sm:$0xff]  ;;  %v2794_v33 = vld [vmem:[#allocation2 + $0xb0] sm:$0xff] }
  0xe6   : > { %1589 = vmatprep.mubr.bf16.mxu0 %v987_v52  ;;  %v991_v51 = vpack.c.bf16 %v980_v53, %v979_v60  ;;  %v565_v46 = vmul.f32 %v2677_v55, %v2482_v29  ;;  %v600_v6 = vmul.f32 %v2484_v30, %v2515_v50  ;;  %v601_v57 = vmul.f32 %v2484_v30, %v3205_v23 }
  0xe7   : > { %v921_v17 = vadd.f32 %v905_v39, %v869_v0  ;;  %v652_v2 = vmul.f32 %v2685_v56, %v2486_v31  ;;  %v922_v16 = vadd.f32 %v906_v14, %v870_v40  ;;  %v653_v36 = vmul.f32 %v2687_v34, %v2486_v31  ;;  %v2800_v0 = vld [vmem:[#allocation2 + $0xaa] sm:$0xff] }
  0xe8   : > { %1597 = vmatprep.mubr.bf16.mxu1 %v991_v51  ;;  %v704_v4 = vmul.f32 %v2699_v62, %v2492_v38  ;;  %v705_v13 = vmul.f32 %v2701_v12, %v2492_v38  ;;  %v616_v24 = vadd.f32 %v600_v6, %v564_v8  ;;  %v617_v5 = vadd.f32 %v601_v57, %v565_v46  ;;  %v3210_v51 = vld [vmem:[#allocation39_spill] sm:$0xff]  ;;  %v3214_v34 = vld [vmem:[#allocation34_spill] sm:$0xff] }
  0xe9   : > { %v973_v59 = vadd.f32 %v957_v20, %v921_v17  ;;  %v756_v49 = vmul.f32 %v2497_v41, %v3206_v26  ;;  %v974_v45 = vadd.f32 %v958_v1, %v922_v16  ;;  %v757_v48 = vmul.f32 %v2497_v41, %v3207_v15  ;;  %v3209_v20 = vld [vmem:[#allocation38_spill] sm:$0xff]  ;;  %v2806_v8 = vld [vmem:[#allocation2 + $0xb2] sm:$0xff] }
  0xea   : > { %v808_v60 = vmul.f32 %v3208_v54, %v2499_v42  ;;  %v809_v9 = vmul.f32 %v2709_v35, %v2499_v42  ;;  %v668_v52 = vadd.f32 %v652_v2, %v616_v24  ;;  %v669_v53 = vadd.f32 %v653_v36, %v617_v5 }
  0xeb   : > { %v861_v37 = vmul.f32 %v2501_v43, %v2792_v47  ;;  %v862_v39 = vmul.f32 %v2501_v43, %v2794_v33  ;;  %v988_v14 = vpack.c.bf16 %v974_v45, %v973_v59  ;;  %v913_v1 = vmul.f32 %v2503_v44, %v3209_v20 }
  0xec   : > { %v914_v40 = vmul.f32 %v2503_v44, %v3210_v51  ;;  %v965_v46 = vmul.f32 %v2549_v63, %v2800_v0  ;;  %v720_v17 = vadd.f32 %v704_v4, %v668_v52  ;;  %v721_v6 = vadd.f32 %v705_v13, %v669_v53 }
  0xed   : > { %v966_v57 = vmul.f32 %v2549_v63, %v2806_v8  ;;  %v558_v2 = vmul.f32 %v2598_v18, %v2482_v29  ;;  %1590 = vmatmul.mubr.bf16.vlgmr.msra.gmra.mxu0 %v988_v14  ;;  %v559_v16 = vmul.f32 %v2600_v22, %v2482_v29  ;;  %v594_v36 = vmul.f32 %v2484_v30, %v2471_v21 }
  0xee   : > { %v595_v59 = vmul.f32 %v2484_v30, %v2477_v25  ;;  %v646_v4 = vmul.f32 %v2618_v27, %v2486_v31  ;;  %v772_v13 = vadd.f32 %v756_v49, %v720_v17  ;;  %v773_v24 = vadd.f32 %v757_v48, %v721_v6  ;;  %v3211_v17 = vld [vmem:[#allocation40_spill] sm:$0xff] }
  0xef   : > { %v647_v5 = vmul.f32 %v2620_v28, %v2486_v31  ;;  %v698_v18 = vmul.f32 %v2748_v19, %v2492_v38  ;;  %v610_v45 = vadd.f32 %v594_v36, %v558_v2  ;;  %v699_v22 = vmul.f32 %v2750_v58, %v2492_v38  ;;  %v3212_v36 = vld [vmem:[#allocation41_spill] sm:$0xff] }
  0xf0   : > { %v611_v52 = vadd.f32 %v595_v59, %v559_v16  ;;  %v750_v21 = vmul.f32 %v2497_v41, %v2564_v3  ;;  %v824_v25 = vadd.f32 %v808_v60, %v772_v13  ;;  %v825_v53 = vadd.f32 %v809_v9, %v773_v24  ;;  %v3213_v9 = vld [vmem:[#allocation33_spill] sm:$0xff] }
  0xf1   : > { %v751_v27 = vmul.f32 %v2497_v41, %v2581_v11  ;;  %v802_v49 = vmul.f32 %v2758_v10, %v2499_v42  ;;  %v662_v28 = vadd.f32 %v646_v4, %v610_v45  ;;  %v803_v14 = vmul.f32 %v2760_v61, %v2499_v42 }
  0xf2   : > { %v663_v48 = vadd.f32 %v647_v5, %v611_v52  ;;  %v855_v6 = vmul.f32 %v2501_v43, %v3211_v17  ;;  %v877_v2 = vadd.f32 %v861_v37, %v824_v25  ;;  %v878_v16 = vadd.f32 %v862_v39, %v825_v53  ;;  %v3215_v5 = vld [vmem:[#allocation42_spill] sm:$0xff] }
  0xf3   : > { %v856_v60 = vmul.f32 %v2501_v43, %v3212_v36  ;;  %v907_v59 = vmul.f32 %v2503_v44, %v3213_v9  ;;  %v714_v13 = vadd.f32 %v698_v18, %v662_v28  ;;  %v908_v4 = vmul.f32 %v2503_v44, %v3214_v34 }
  0xf4   : > { %v715_v24 = vadd.f32 %v699_v22, %v663_v48  ;;  %v959_v45 = vmul.f32 %v2549_v63, %v3215_v5  ;;  %v929_v52 = vadd.f32 %v913_v1, %v877_v2  ;;  %v930_v56 = vadd.f32 %v914_v40, %v878_v16 }
  0xf5   : > { %v960_v37 = vmul.f32 %v2549_v63, %v3216_v7  ;;  %v566_v39 = vmul.f32 %v2699_v62, %v2482_v29  ;;  %v766_v25 = vadd.f32 %v750_v21, %v714_v13  ;;  %v567_v18 = vmul.f32 %v2701_v12, %v2482_v29  ;;  %v2862_v21 = vld [vmem:[%s380_s14] sm:$0xff] }
  0xf6   : > { %v767_v53 = vadd.f32 %v751_v27, %v715_v24  ;;  %v602_v22 = vmul.f32 %v2484_v30, %v3206_v26  ;;  %v981_v28 = vadd.f32 %v965_v46, %v929_v52  ;;  %v982_v48 = vadd.f32 %v966_v57, %v930_v56 }
  0xf7   : > { %v603_v1 = vmul.f32 %v2484_v30, %v3207_v15  ;;  %v654_v40 = vmul.f32 %v3208_v54, %v2486_v31  ;;  %v818_v2 = vadd.f32 %v802_v49, %v766_v25  ;;  %v655_v62 = vmul.f32 %v2709_v35, %v2486_v31 }
  0xf8   : > { %v819_v16 = vadd.f32 %v803_v14, %v767_v53  ;;  %v618_v23 = vadd.f32 %v602_v22, %v566_v39  ;;  %v992_v12 = vpack.c.bf16 %v982_v48, %v981_v28  ;;  %v706_v56 = vmul.f32 %v2792_v47, %v2492_v38  ;;  %v3217_v22 = vld [vmem:[#allocation44_spill] sm:$0xff] }
  0xf9   : > { %v619_v27 = vadd.f32 %v603_v1, %v567_v18  ;;  %v707_v26 = vmul.f32 %v2794_v33, %v2492_v38  ;;  %v871_v15 = vadd.f32 %v855_v6, %v818_v2  ;;  %v758_v57 = vmul.f32 %v2497_v41, %v3209_v20  ;;  %v3218_v1 = vld [vmem:[#allocation45_spill] sm:$0xff] }
  0xfa   : > { %v872_v46 = vadd.f32 %v856_v60, %v819_v16  ;;  %v670_v54 = vadd.f32 %v654_v40, %v618_v23  ;;  %1598 = vmatmul.mubr.bf16.vlgmr.msra.gmra.mxu1 %v992_v12  ;;  %v759_v35 = vmul.f32 %v2497_v41, %v3210_v51  ;;  %v810_v14 = vmul.f32 %v2800_v0, %v2499_v42  ;;  %v2877_v23 = vld [vmem:[#allocation2 + $0xc0] sm:$0xff]  ;;  %v2879_v60 = vld [vmem:[#allocation2 + $0xc8] sm:$0xff] }
  0xfb   : > { %v671_v49 = vadd.f32 %v655_v62, %v619_v27  ;;  %v524_v13 = vmax.f32 %v2862_v21, 0.0  ;;  %v923_v24 = vadd.f32 %v907_v59, %v871_v15  ;;  %v811_v6 = vmul.f32 %v2806_v8, %v2499_v42  ;;  %v2889_v2 = vld [vmem:[#allocation2 + $0xc2] sm:$0xff] }
  0xfc   : > { %v924_v52 = vadd.f32 %v908_v4, %v872_v46  ;;  %v722_v39 = vadd.f32 %v706_v56, %v670_v54  ;;  %v863_v53 = vmul.f32 %v2501_v43, %v2877_v23  ;;  %v864_v18 = vmul.f32 %v2501_v43, %v2879_v60 }
  0xfd   : > { %v723_v25 = vadd.f32 %v707_v26, %v671_v49  ;;  %v915_v59 = vmul.f32 %v2503_v44, %v3217_v22  ;;  %v975_v4 = vadd.f32 %v959_v45, %v923_v24  ;;  %v916_v40 = vmul.f32 %v2503_v44, %v3218_v1  ;;  %v523_v26 = vld [vmem:[%s380_s14 + $0x8] sm:$0xff]  ;;  %s2983_s14 = scalar_lea.hbm %s3226_s2, %s1483_s8 }
  0xfe   : > { %v976_v28 = vadd.f32 %v960_v37, %v924_v52  ;;  %v774_v48 = vadd.f32 %v758_v57, %v722_v39  ;;  %v967_v62 = vmul.f32 %v2549_v63, %v2889_v2  ;;  %v560_v21 = vmul.f32 %v2748_v19, %v2482_v29  ;;  %v948_v57 = vld [vmem:[#allocation2 + $0xca] sm:$0xff] }
  0xff   : > { %v775_v16 = vadd.f32 %v759_v35, %v723_v25  ;;  %v561_v12 = vmul.f32 %v2750_v58, %v2482_v29  ;;  %v596_v45 = vmul.f32 %v2484_v30, %v2564_v3  ;;  %v597_v37 = vmul.f32 %v2484_v30, %v2581_v11 }
 0x100   : > { %v989_v27 = vpack.c.bf16 %v976_v28, %v975_v4  ;;  %v826_v56 = vadd.f32 %v810_v14, %v774_v48  ;;  %v648_v46 = vmul.f32 %v2758_v10, %v2486_v31  ;;  %v649_v19 = vmul.f32 %v2760_v61, %v2486_v31  ;;  %v3219_v48 = vld [vmem:[#allocation35_spill] sm:$0xff] }
 0x101   : > { %v827_v15 = vadd.f32 %v811_v6, %v775_v16  ;;  %v700_v58 = vmul.f32 %v2492_v38, %v3211_v17  ;;  %v612_v49 = vadd.f32 %v596_v45, %v560_v21  ;;  %v613_v3 = vadd.f32 %v597_v37, %v561_v12 }
 0x102   : > { %1593 = vmatprep.mubr.bf16.mxu0 %v989_v27  ;;  %v879_v54 = vadd.f32 %v863_v53, %v826_v56  ;;  %v701_v11 = vmul.f32 %v2492_v38, %v3212_v36  ;;  %v968_v14 = vmul.f32 %v2549_v63, %v948_v57  ;;  %v752_v10 = vmul.f32 %v2497_v41, %v3213_v9 }
 0x103   : > { %v880_v35 = vadd.f32 %v864_v18, %v827_v15  ;;  %v525_v24 = vmax.f32 %v523_v26, 0.0  ;;  %v664_v61 = vadd.f32 %v648_v46, %v612_v49  ;;  %v665_v39 = vadd.f32 %v649_v19, %v613_v3  ;;  %v3222_v46 = vld [vmem:[#allocation47_spill] sm:$0xff] }
 0x104   : > { %v931_v52 = vadd.f32 %v915_v59, %v879_v54  ;;  %v753_v17 = vmul.f32 %v2497_v41, %v3214_v34  ;;  %v804_v25 = vmul.f32 %v2499_v42, %v3215_v5  ;;  %v805_v36 = vmul.f32 %v2499_v42, %v3216_v7  ;;  %v3220_v5 = vld [vmem:[#allocation49_spill] sm:$0xff] }
 0x105   : > { %v932_v6 = vadd.f32 %v916_v40, %v880_v35  ;;  %v857_v53 = vmul.f32 %v2501_v43, %v2668_v32  ;;  %v716_v4 = vadd.f32 %v700_v58, %v664_v61  ;;  %v717_v9 = vadd.f32 %v701_v11, %v665_v39 }
 0x106   : > { %v983_v18 = vadd.f32 %v967_v62, %v931_v52  ;;  %v858_v59 = vmul.f32 %v2501_v43, %v2677_v55  ;;  %v909_v34 = vmul.f32 %v2503_v44, %v2515_v50  ;;  %v910_v40 = vmul.f32 %v2503_v44, %v3219_v48 }
 0x107   : > { %v984_v28 = vadd.f32 %v968_v14, %v932_v6  ;;  %v527_v16 = vmul.f32 %v3220_v5, %v524_v13  ;;  %v768_v21 = vadd.f32 %v752_v10, %v716_v4  ;;  %v769_v7 = vadd.f32 %v753_v17, %v717_v9 }
 0x108   : > { %v528_v12 = vmul.f32 %v3220_v5, %v525_v24  ;;  %v568_v32 = vmul.f32 %v2792_v47, %v2482_v29  ;;  %v569_v55 = vmul.f32 %v2794_v33, %v2482_v29  ;;  %v604_v50 = vmul.f32 %v2484_v30, %v3209_v20 }
 0x109   : > { %v993_v62 = vpack.c.bf16 %v984_v28, %v983_v18  ;;  %530 = vst [vmem:[#allocation2 + $0xd9] sm:$0xff] %v527_v16  ;;  %v605_v27 = vmul.f32 %v2484_v30, %v3210_v51  ;;  %v820_v56 = vadd.f32 %v804_v25, %v768_v21  ;;  %v821_v13 = vadd.f32 %v805_v36, %v769_v7  ;;  %v3221_v51 = vld [vmem:[#allocation46_spill] sm:$0xff] }
 0x10a   : > { %531 = vst [vmem:[#allocation2 + $0xe1] sm:$0xff] %v528_v12  ;;  %v656_v45 = vmul.f32 %v2800_v0, %v2486_v31  ;;  %v657_v47 = vmul.f32 %v2806_v8, %v2486_v31  ;;  %v620_v37 = vadd.f32 %v604_v50, %v568_v32  ;;  %v708_v29 = vmul.f32 %v2877_v23, %v2492_v38 }
 0x10b   : > { %1601 = vmatprep.mubr.bf16.mxu1 %v993_v62  ;;  %v621_v26 = vadd.f32 %v605_v27, %v569_v55  ;;  %v709_v33 = vmul.f32 %v2879_v60, %v2492_v38  ;;  %v873_v20 = vadd.f32 %v857_v53, %v820_v56  ;;  %v874_v30 = vadd.f32 %v858_v59, %v821_v13 }
 0x10c   : > { %v961_v15 = vmul.f32 %v2549_v63, %v3221_v51  ;;  %v962_v0 = vmul.f32 %v2549_v63, %v3222_v46  ;;  %v672_v19 = vadd.f32 %v656_v45, %v620_v37  ;;  %v760_v31 = vmul.f32 %v2497_v41, %v3217_v22 }
 0x10d   : > { %v673_v58 = vadd.f32 %v657_v47, %v621_v26  ;;  %v761_v8 = vmul.f32 %v2497_v41, %v3218_v1  ;;  %v925_v23 = vadd.f32 %v909_v34, %v873_v20  ;;  %v926_v54 = vadd.f32 %v910_v40, %v874_v30  ;;  %v1454_v34 = vld [vmem:[%s3223_s22] ss:$0 sm:$0xff] }
 0x10e   : > { %v724_v49 = vadd.f32 %v708_v29, %v672_v19  ;;  %v812_v60 = vmul.f32 %v2889_v2, %v2499_v42  ;;  %v813_v3 = vmul.f32 %v948_v57, %v2499_v42  ;;  %v917_v25 = vmul.f32 %v2503_v44, %v527_v16 }
 0x10f   : > { %v725_v38 = vadd.f32 %v709_v33, %v673_v58  ;;  %v977_v11 = vadd.f32 %v961_v15, %v925_v23  ;;  %v978_v35 = vadd.f32 %v962_v0, %v926_v54  ;;  %v918_v42 = vmul.f32 %v2503_v44, %v528_v12 }
 0x110   : > { %v845_v14 = vld [vmem:[#allocation2 + $0xd8] sm:$0xff]  ;;  %v776_v10 = vadd.f32 %v760_v31, %v724_v49 }
 0x111   : > { %v777_v24 = vadd.f32 %v761_v8, %v725_v38  ;;  %v846_v52 = vld [vmem:[#allocation2 + $0xe0] sm:$0xff]  ;;  %v865_v22 = vmul.f32 %v2501_v43, %v845_v14  ;;  %v990_v61 = vpack.c.bf16 %v978_v35, %v977_v11 }
 0x112   : > { %v866_v41 = vmul.f32 %v2501_v43, %v846_v52  ;;  %v949_v1 = vld [vmem:[#allocation2 + $0xda] sm:$0xff]  ;;  %v950_v39 = vld [vmem:[#allocation2 + $0xe2] sm:$0xff]  ;;  %v828_v17 = vadd.f32 %v812_v60, %v776_v10 }
 0x113   : > { %v829_v6 = vadd.f32 %v813_v3, %v777_v24  ;;  %1594 = vmatmul.mubr.bf16.gmra.mxu0 %v990_v61  ;;  %v969_v36 = vmul.f32 %v2549_v63, %v949_v1  ;;  %v970_v53 = vmul.f32 %v2549_v63, %v950_v39 }
 0x114   : > { %v881_v2 = vadd.f32 %v865_v22, %v828_v17 }
 0x115   : > { %v882_v57 = vadd.f32 %v866_v41, %v829_v6 }
 0x116   : > { %v933_v18 = vadd.f32 %v917_v25, %v881_v2 }
 0x117   : > { %v934_v4 = vadd.f32 %v918_v42, %v882_v57 }
 0x118   : > { %v985_v9 = vadd.f32 %v969_v36, %v933_v18 }
 0x119   : > { %v986_v43 = vadd.f32 %v970_v53, %v934_v4 }
 0x11b   : > { %v994_v59 = vpack.c.bf16 %v986_v43, %v985_v9 }
 0x11d   : > { %1602 = vmatmul.mubr.bf16.gmra.mxu1 %v994_v59 }
 0x1ad   : > { %v1591_v28 = vpop.f32.mrf.mxu0 }
 0x1ae   : > { %v1109_v40 = vadd.f32 %v1591_v28, %v1454_v34 }
 0x1af   : > { %v1100_v48 = vpop.f32.mrf.mxu0 }
 0x1b0   : > { %v1101_v21 = vadd.f32 %v1454_v34, %v1100_v48 }
 0x1b1   : > { %v1592_v44 = vpop.f32.mrf.mxu0 }
 0x1b2   : > { %v1112_v5 = vadd.f32 %v1592_v44, %v1454_v34 }
 0x1b3   : > { %v1103_v16 = vpop.f32.mrf.mxu0 }
 0x1b4   : > { %v1518_v7 = vpack.c.bf16 %v1112_v5, %v1109_v40  ;;  %v1104_v63 = vadd.f32 %v1454_v34, %v1103_v16 }
 0x1b6   : > { %1550 = vst [vmem:[%s2967_s18 + $0x8] sm:$0xff] %v1518_v7   ;;  %v1513_v12 = vpack.c.bf16 %v1104_v63, %v1101_v21 }
 0x1b8   : > { %1514 = vst [vmem:[%s2967_s18] sm:$0xff] %v1513_v12  }
 0x1ba   : > { %v1599_v32 = vpop.f32.mrf.mxu1 }
 0x1bb   : > { %v1141_v50 = vadd.f32 %v1599_v32, %v1454_v34 }
 0x1bc   : > { %v1132_v62 = vpop.f32.mrf.mxu1 }
 0x1bd   : > { %v1133_v13 = vadd.f32 %v1454_v34, %v1132_v62 }
 0x1be   : > { %v1600_v55 = vpop.f32.mrf.mxu1 }
 0x1bf   : > { %v1144_v27 = vadd.f32 %v1600_v55, %v1454_v34 }
 0x1c0   : > { %v1135_v56 = vpop.f32.mrf.mxu1 }
 0x1c1   : > { %v1538_v45 = vpack.c.bf16 %v1144_v27, %v1141_v50  ;;  %v1136_v47 = vadd.f32 %v1454_v34, %v1135_v56 }
 0x1c3   : > { %1554 = vst [vmem:[%s2967_s18 + $0x28] sm:$0xff] %v1538_v45   ;;  %v1533_v37 = vpack.c.bf16 %v1136_v47, %v1133_v13 }
 0x1c5   : > { %1553 = vst [vmem:[%s2967_s18 + $0x20] sm:$0xff] %v1533_v37  }
 0x1d3   : > { %v1595_v26 = vpop.f32.mrf.mxu0 }
 0x1d4   : > { %v1125_v20 = vadd.f32 %v1595_v26, %v1454_v34 }
 0x1d5   : > { %v1116_v29 = vpop.f32.mrf.mxu0 }
 0x1d6   : > { %v1117_v15 = vadd.f32 %v1454_v34, %v1116_v29 }
 0x1d7   : > { %v1596_v33 = vpop.f32.mrf.mxu0 }
 0x1d8   : > { %v1128_v30 = vadd.f32 %v1596_v33, %v1454_v34 }
 0x1d9   : > { %v1119_v51 = vpop.f32.mrf.mxu0 }
 0x1da   : > { %v1528_v46 = vpack.c.bf16 %v1128_v30, %v1125_v20  ;;  %v1120_v0 = vadd.f32 %v1454_v34, %v1119_v51 }
 0x1dc   : > { %1552 = vst [vmem:[%s2967_s18 + $0x18] sm:$0xff] %v1528_v46   ;;  %v1523_v58 = vpack.c.bf16 %v1120_v0, %v1117_v15 }
 0x1dd   : > { %v1603_v19 = vpop.f32.mrf.mxu1 }
 0x1de   : > { %1551 = vst [vmem:[%s2967_s18 + $0x10] sm:$0xff] %v1523_v58   ;;  %v1157_v23 = vadd.f32 %v1603_v19, %v1454_v34 }
 0x1df   : > { %v1148_v31 = vpop.f32.mrf.mxu1 }
 0x1e0   : > { %v1149_v38 = vadd.f32 %v1454_v34, %v1148_v31 }
 0x1e1   : > { %v1604_v8 = vpop.f32.mrf.mxu1 }
 0x1e2   : > { %v1160_v54 = vadd.f32 %v1604_v8, %v1454_v34 }
 0x1e3   : > { %v1151_v49 = vpop.f32.mrf.mxu1 }
 0x1e4   : > { %v1548_v60 = vpack.c.bf16 %v1160_v54, %v1157_v23  ;;  %v1152_v3 = vadd.f32 %v1454_v34, %v1151_v49 }
 0x1e6   : > { %1556 = vst [vmem:[%s2967_s18 + $0x38] sm:$0xff] %v1548_v60   ;;  %v1543_v11 = vpack.c.bf16 %v1152_v3, %v1149_v38 }
 0x1e8   : > { %1555 = vst [vmem:[%s2967_s18 + $0x30] sm:$0xff] %v1543_v11  }
 0x1e9   : > { %1942 = shalt.err (!%p1939_p0)
}
 0x1ea   : > { %s1943_s7 = scalar_lea.hbm %s2983_s14, 1024  ;;  %s1947_s15 = scalar_lea.hbm %s3226_s2, 4096 }
 0x1eb   : > { %p1944_p3 = scmp.ne.s32.totalorder %s2983_s14, %s1943_s7  ;;  %p1948_p6 = scmp.lt.s32.totalorder %s2983_s14, %s3226_s2 }
 0x1ec   : > { %p1949_p11 = scmp.lt.s32.totalorder %s1947_s15, %s1943_s7 }
 0x1ed   : > { %p1945_p4 = pnand %p1944_p3, %p3227_p8 }
 0x1ee   : > { %p1950_p5 = por %p1949_p11, %p1948_p6 }
 0x1ef   : > { %p1946_p9 = pneg %p1945_p4 }
 0x1f1   : > { %p1951_p12 = pnand %p1950_p5, %p1946_p9 }
 0x1f3   : > { %1954 = shalt.err (!%p1951_p12)
}
 0x1f4   : > { %s2098_s24 = smov 64   ;;  %s2099_s4 = smov 4  }
 0x1f5   : > { %1635 = dma.vmem_to_hbm [thread:$0]  (%p3227_p8), %s2978_s5, 1024, %s2983_s14, %s1244_s13, %s2098_s24, %s2098_s24, %s2099_s4  }
 0x1f6 PF: > { %s3228_s17 = sld [smem:[#allocation20_spill]]  ;;  %p1663_p10 = scmp.ge.s32.totalorder %s2085_s10, 2 }
 0x1f7   : > { %s3229_s8 = sld [smem:[#allocation30_spill]] }
 0x1fc   : > { %s1275_s16 = sand.u32 1, %s3228_s17  }
 0x1fd   : > { %p3230_p2 = scmp.ne.s32.totalorder %s3229_s8, 0  ;;  %s1276_s30 = scalar_lea.sflag [#allocation5], %s1275_s16 }
 0x1ff   : > { %p1655_p1 = pnand %p1663_p10, %p3230_p2 }
 0x201   : > { %p1656_p7 = pneg %p1655_p1 }
 0x203   : > { %2028 = dma.done.wait (%p1656_p7), %s1276_s30, 1024  }
 0x204   : > { %2030 = vsyncadd (%p1656_p7), %s1276_s30, 4294966272  ;;  %s26_s10 = sadd.s32 1, %s2085_s10   ;;  %s3232_s21 = sld [smem:[#allocation19_spill]] }
 0x205   : > { %p3015_p13 = scmp.ge.s32.totalorder %s26_s10, 6   ;;  %s3233_s24 = sld [smem:[#allocation21_spill]] }
 0x206   : > { %s3234_s5 = smov %s2347_s27  ;;  %s3235_s30 = sld [smem:[#allocation24_spill]] }
 0x207   : > { %s3236_s7 = sld [smem:[#allocation25_spill]]  ;;  %s3239_s22 = smov %s2041_s23 }
 0x208   : > { %s3237_s8 = sld [smem:[#allocation27_spill]]  ;;  %s3240_s23 = smov %s2404_s3 }
 0x209   : > { %s3238_s9 = sld [smem:[#allocation31_spill]]  ;;  %s3241_s25 = smov %s2053_s26 }
 0x20a   : > { %s3242_s26 = smov %s2356_s1  ;;  %s3243_s27 = smov %s2061_s28 }
 0x20b   : > { %s3244_s28 = smov %s2065_s29  ;;  %s3245_s29 = smov %s3234_s5 }
 0x20c   :  { %25 = sbr.rel (!%p3015_p13) target bundleno = 20 (0x14), region = 124 }
 0x211   :  { %1281 = vsyncpa [#allocation4], 1 }
 0x212   :  { %1283 = vsyncpa [#allocation4 + $0x1], 1 }
 0x213   :  { %1284 = vsyncpa [#allocation7], 1 }
 0x214   :  { %1286 = vsyncpa [#allocation7 + $0x1], 1 }
 0x215   :  { %1287 = vsyncpa [#allocation10], 1 }
 0x216   :  { %1288 = vsyncpa [#allocation5], 1 }
 0x217   :  { %1290 = vsyncpa [#allocation5 + $0x1], 1 }

</bundles_post_ra>
